<compile_context>
chip_gen: v7x
topology: tpu7x:2x2x1
jax: 0.10.0
libtpu: 0.0.40
codegen_flags: <defaults>
</compile_context>

<pallas_src>
import functools

import jax
import jax.numpy as jnp
from jax.experimental import pallas as pl
from jax.experimental.pallas import tpu as pltpu

GRAPH_SIZE = 16      # cfg['data']['graph_size'] — synthetic config
IN_CHANNELS = 16
OUT_CHANNELS = 32


def _round_up(x, m):
    return ((x + m - 1) // m) * m


def _gcn_math(A, Xf, w, c_out):
    """relu(D^-1/2 (A+I) D^-1/2 Xf W) for a block of TB graphs (float32)."""
    tb, n, c_in = Xf.shape

    # sqrt(pinv(D)) for diagonal D: rsqrt(deg) where deg != 0 else 0.
    deg = jnp.sum(A, axis=2, keepdims=True)                       # (TB, N, 1)
    nz = deg != 0.0
    dinv = jnp.where(nz, jax.lax.rsqrt(jnp.where(nz, deg, 1.0)), 0.0)

    # Aggregate first (narrow C_in), transform once afterwards:
    #   dinv * ((A+I) @ (dinv*Xf)) @ W == D^-1/2 (A+I) D^-1/2 Xf W
    # Self-loop folded into an add: (A+I)@Y == A@Y + Y (no identity materialized).
    y = dinv * Xf                                                  # (TB, N, C_in)
    ay = jnp.einsum("bij,bjc->bic", A, y,
                    preferred_element_type=jnp.float32)            # (TB, N, C_in)
    z = dinv * (ay + y)                                            # (TB, N, C_in)

    # Single weight-stationary MXU matmul over all TB*N nodes (leading-dim reshape only).
    h = jnp.dot(z.reshape(tb * n, c_in), w,
                preferred_element_type=jnp.float32)                # (TB*N, C_out)
    return jnp.maximum(h.reshape(tb, n, c_out), 0.0)               # relu


def gcn_kernel_lane_dense(x_ref, w_ref, o_ref, *, gs, c_in, c_out):
    # x_ref: (TB, N*(GS+C_in)) lane-dense   w_ref: (C_in, C_out)
    # o_ref: (TB, N*(GS+C_out)) lane-dense
    tb = x_ref.shape[0]
    x = x_ref[...].reshape(tb, gs, gs + c_in)       # in-VMEM relayout, hidden by DMA slack
    A = x[:, :, :gs]                                # (TB, N, N)
    Xf = x[:, :, gs:]                               # (TB, N, C_in)
    feat = _gcn_math(A, Xf, w_ref[...], c_out)      # (TB, N, C_out)
    # Fused torch.cat([A, relu(...)], -1) packed into a 128-lane-dense slab:
    # one unmasked, fully contiguous store + contiguous HBM writeback.
    out = jnp.concatenate([A, feat], axis=-1)       # (TB, N, GS+C_out)
    o_ref[...] = out.reshape(tb, gs * (gs + c_out)).astype(o_ref.dtype)


def gcn_kernel_3d(x_ref, w_ref, o_ref, *, gs, c_in, c_out):
    # Fallback: natural (TB, N, F) layout (strided DMA strips, masked partial stores).
    x = x_ref[...]
    A = x[:, :, :gs]
    Xf = x[:, :, gs:]
    feat = _gcn_math(A, Xf, w_ref[...], c_out)
    o_ref[:, :, :gs] = A.astype(o_ref.dtype)
    o_ref[:, :, gs:] = feat.astype(o_ref.dtype)


def _pallas_gcn(X, W, tb, lane_dense):
    B, N, F = X.shape
    c_in, c_out = W.shape
    f_out = GRAPH_SIZE + c_out

    # Pad batch to a multiple of tb. Zero-padded graphs: deg=0 -> dinv=0 -> output 0;
    # harmless and sliced off afterwards.
    b_pad = pl.cdiv(B, tb) * tb
    if b_pad != B:
        X = jnp.pad(X, ((0, b_pad - B), (0, 0), (0, 0)))
    grid = (b_pad // tb,)

    params = pltpu.CompilerParams(
        dimension_semantics=("parallel",),          # megacore sharding of batch steps
        vmem_limit_bytes=32 * 1024 * 1024,          # v5e scoped default is only 16 MiB
    )

    if lane_dense:
        Xd = X.reshape(b_pad, N * F)                # contiguous -> free wrapper reshape
        out2 = pl.pallas_call(
            functools.partial(gcn_kernel_lane_dense,
                              gs=GRAPH_SIZE, c_in=c_in, c_out=c_out),
            out_shape=jax.ShapeDtypeStruct((b_pad, N * f_out), jnp.float32),
            grid_spec=pltpu.PrefetchScalarGridSpec(
                num_scalar_prefetch=0,
                grid=grid,
                in_specs=[
                    pl.BlockSpec((tb, N * F), lambda b: (b, 0)),        # 512 lanes, dense
                    pl.BlockSpec((c_in, c_out), lambda b: (0, 0)),      # weights, reused
                ],
                out_specs=pl.BlockSpec((tb, N * f_out), lambda b: (b, 0)),  # 768 lanes
            ),
            compiler_params=params,
        )(Xd, W)
        out = out2.reshape(b_pad, N, f_out)         # contiguous -> free wrapper reshape
    else:
        out = pl.pallas_call(
            functools.partial(gcn_kernel_3d,
                              gs=GRAPH_SIZE, c_in=c_in, c_out=c_out),
            out_shape=jax.ShapeDtypeStruct((b_pad, N, f_out), jnp.float32),
            grid_spec=pltpu.PrefetchScalarGridSpec(
                num_scalar_prefetch=0,
                grid=grid,
                in_specs=[
                    pl.BlockSpec((tb, N, F), lambda b: (b, 0, 0)),
                    pl.BlockSpec((c_in, c_out), lambda b: (0, 0)),
                ],
                out_specs=pl.BlockSpec((tb, N, f_out), lambda b: (b, 0, 0)),
            ),
            compiler_params=params,
        )(X, W)

    return out[:B] if b_pad != B else out


def gcn_conv(X, W, *, tb=None):
    """X: (B, N, GRAPH_SIZE + C_in), W: (C_in, C_out) -> (B, N, GRAPH_SIZE + C_out)."""
    X = jnp.asarray(X, jnp.float32)
    W = jnp.asarray(W, jnp.float32)
    B, N, F = X.shape
    c_in, c_out = W.shape
    assert N == GRAPH_SIZE and F == GRAPH_SIZE + c_in

    if tb is None:
        # >= 4 grid steps so the pipeline has overlap; cap at 256 since 128-lane-padded
        # temporaries cost ~8 KiB * tb each (v6e: sweep to 512 w/ higher vmem_limit).
        tb = max(8, min(256, _round_up(pl.cdiv(B, 4), 8)))
    tb = max(8, _round_up(tb, 8))   # (8,128)-rule: second-minor of 2-D blocks

    try:
        return _pallas_gcn(X, W, tb, lane_dense=True)
    except Exception:
        # TODO(synk): fallback if this jax/Mosaic build can't lower the in-kernel
        # lane-dense relayout (reshape/concat); semantics are identical either way.
        return _pallas_gcn(X, W, tb, lane_dense=False)


def gcn_conv_ref(X, W):
    """Pure-JAX reference mirroring the PyTorch forward (in float32)."""
    A = X[:, :, :GRAPH_SIZE]
    Xf = X[:, :, GRAPH_SIZE:]
    deg = jnp.sum(A, axis=2)
    dinv = jnp.where(deg != 0.0, 1.0 / jnp.sqrt(deg), 0.0)
    a_hat = A + jnp.eye(GRAPH_SIZE, dtype=X.dtype)[None]
    a_hat = dinv[:, :, None] * a_hat * dinv[:, None, :]
    out = jax.nn.relu(jnp.einsum("bij,bjc,cd->bid", a_hat, Xf, W))
    return jnp.concatenate([A, out], axis=2)


if __name__ == "__main__":
    key = jax.random.PRNGKey(0)
    kx, kw = jax.random.split(key)
    B = 34   # not a multiple of tb -> exercises batch padding; grid gets 5 steps
    X = jax.random.uniform(kx, (B, GRAPH_SIZE, GRAPH_SIZE + IN_CHANNELS),
                           dtype=jnp.float32)
    # A couple of all-zero adjacency rows exercise the pinv(D) -> 0 branch.
    X = X.at[0, 3, :GRAPH_SIZE].set(0.0)
    X = X.at[5, 0, :GRAPH_SIZE].set(0.0)
    W = jax.random.uniform(kw, (IN_CHANNELS, OUT_CHANNELS), dtype=jnp.float32)

    out = jax.block_until_ready(gcn_conv(X, W, tb=8))   # 5 grid steps + padding path
    ref = jax.block_until_ready(gcn_conv_ref(X, W))

    assert out.shape == (B, GRAPH_SIZE, GRAPH_SIZE + OUT_CHANNELS), out.shape
    err = float(jnp.max(jnp.abs(out - ref)))
    assert jnp.allclose(out, ref, rtol=1e-4, atol=1e-4), err
    print("KERNEL_OK")
</pallas_src>

<mosaic_0001>
module attributes {stable_mosaic.version = 11 : i64} {
  func.func @gcn_kernel_lane_dense(%arg0: i32, %arg1: memref<8x512xf32, #tpu.memory_space<vmem>>, %arg2: memref<16x32xf32, #tpu.memory_space<vmem>>, %arg3: memref<8x768xf32, #tpu.memory_space<vmem>>) attributes {dimension_semantics = [#tpu.dimension_semantics<parallel>], iteration_bounds = array<i64: 5>, scalar_prefetch = 0 : i64, scratch_operands = 0 : i64, tpu.core_type = #tpu.core_type<tc>, window_params = [{transform_indices = @transform_0, window_bounds = array<i64: 8, 512>}, {pipeline_mode = #tpu.pipeline_mode<synchronous>, transform_indices = @transform_1, window_bounds = array<i64: 16, 32>}, {transform_indices = @transform_2, window_bounds = array<i64: 8, 768>}]} {
    %c0 = arith.constant 0 : index
    %c0_0 = arith.constant 0 : index
    %0 = vector.load %arg1[%c0, %c0_0] : memref<8x512xf32, #tpu.memory_space<vmem>>, vector<8x512xf32>
    %1 = vector.shape_cast %0 : vector<8x512xf32> to vector<8x16x32xf32>
    %2 = vector.extract_strided_slice %1 {offsets = [0, 0, 0], sizes = [8, 16, 16], strides = [1, 1, 1]} : vector<8x16x32xf32> to vector<8x16x16xf32>
    %3 = vector.extract_strided_slice %1 {offsets = [0, 0, 16], sizes = [8, 16, 16], strides = [1, 1, 1]} : vector<8x16x32xf32> to vector<8x16x16xf32>
    %c0_1 = arith.constant 0 : index
    %c0_2 = arith.constant 0 : index
    %4 = vector.load %arg2[%c0_1, %c0_2] : memref<16x32xf32, #tpu.memory_space<vmem>>, vector<16x32xf32>
    %cst = arith.constant dense<0.000000e+00> : vector<8x16xf32>
    %5 = vector.multi_reduction <add>, %2, %cst [2] : vector<8x16x16xf32> to vector<8x16xf32>
    %6 = vector.shape_cast %5 : vector<8x16xf32> to vector<8x16x1xf32>
    %cst_3 = arith.constant 0.000000e+00 : f32
    %7 = vector.broadcast %cst_3 : f32 to vector<8x16x1xf32>
    %8 = arith.cmpf one, %6, %7 : vector<8x16x1xf32>
    %cst_4 = arith.constant 1.000000e+00 : f32
    %9 = vector.broadcast %cst_4 : f32 to vector<8x16x1xf32>
    %10 = arith.select %8, %6, %9 : vector<8x16x1xi1>, vector<8x16x1xf32>
    %11 = math.rsqrt %10 : vector<8x16x1xf32>
    %cst_5 = arith.constant 0.000000e+00 : f32
    %12 = vector.broadcast %cst_5 : f32 to vector<8x16x1xf32>
    %13 = arith.select %8, %11, %12 : vector<8x16x1xi1>, vector<8x16x1xf32>
    %14 = vector.broadcast %13 : vector<8x16x1xf32> to vector<8x16x16xf32>
    %15 = arith.mulf %14, %3 : vector<8x16x16xf32>
    "tpu.trace_start"() <{level = 10 : i32, message = "bij,bjc->bic"}> : () -> ()
    %cst_6 = arith.constant dense<0.000000e+00> : vector<8x16x16xf32>
    %16 = tpu.matmul %2, %15, %cst_6 {dimension_numbers = #tpu.dot_dimension_numbers<[2], [1], [1], [2], [0, 0, 0, 1, 1, 2], [0], [0]>} : vector<8x16x16xf32>, vector<8x16x16xf32>, vector<8x16x16xf32> -> vector<8x16x16xf32>
    "tpu.trace_stop"() : () -> ()
    %17 = arith.addf %16, %15 : vector<8x16x16xf32>
    %18 = vector.broadcast %13 : vector<8x16x1xf32> to vector<8x16x16xf32>
    %19 = arith.mulf %18, %17 : vector<8x16x16xf32>
    %20 = vector.shape_cast %19 : vector<8x16x16xf32> to vector<128x16xf32>
    %cst_7 = arith.constant dense<0.000000e+00> : vector<128x32xf32>
    %21 = tpu.matmul %20, %4, %cst_7 {dimension_numbers = #tpu.dot_dimension_numbers<[1], [0], [0], [1], [0, 0, 1, 1], [], []>} : vector<128x16xf32>, vector<16x32xf32>, vector<128x32xf32> -> vector<128x32xf32>
    %22 = vector.shape_cast %21 : vector<128x32xf32> to vector<8x16x32xf32>
    %cst_8 = arith.constant 0.000000e+00 : f32
    %23 = vector.broadcast %cst_8 : f32 to vector<8x16x32xf32>
    %24 = arith.maximumf %22, %23 : vector<8x16x32xf32>
    %25 = tpu.concatenate %2, %24 in 2 : vector<8x16x16xf32>, vector<8x16x32xf32> -> vector<8x16x48xf32>
    %26 = vector.shape_cast %25 : vector<8x16x48xf32> to vector<8x768xf32>
    %c0_9 = arith.constant 0 : index
    %c0_10 = arith.constant 0 : index
    %27 = vector.load %arg3[%c0_9, %c0_10] : memref<8x768xf32, #tpu.memory_space<vmem>>, vector<8x768xf32>
    tpu.vector_store %arg3[%c0_9, %c0_10], %26 {strides = array<i32>} : memref<8x768xf32, #tpu.memory_space<vmem>>, vector<8x768xf32>,
    return
  }
  func.func @transform_0(%arg0: i32) -> (i32, i32) {
    %c0_i32 = arith.constant 0 : i32
    %c0_i32_0 = arith.constant 0 : i32
    return %arg0, %c0_i32 : i32, i32
  }
  func.func @transform_1(%arg0: i32) -> (i32, i32) {
    %c0_i32 = arith.constant 0 : i32
    %c0_i32_0 = arith.constant 0 : i32
    %c0_i32_1 = arith.constant 0 : i32
    return %c0_i32, %c0_i32_0 : i32, i32
  }
  func.func @transform_2(%arg0: i32) -> (i32, i32) {
    %c0_i32 = arith.constant 0 : i32
    %c0_i32_0 = arith.constant 0 : i32
    return %arg0, %c0_i32 : i32, i32
  }
}

module attributes {stable_mosaic.version = 11 : i64} {
  func.func @gcn_kernel_3d(%arg0: i32, %arg1: memref<8x16x32xf32, #tpu.memory_space<vmem>>, %arg2: memref<16x32xf32, #tpu.memory_space<vmem>>, %arg3: memref<8x16x48xf32, #tpu.memory_space<vmem>>) attributes {dimension_semantics = [#tpu.dimension_semantics<parallel>], iteration_bounds = array<i64: 5>, scalar_prefetch = 0 : i64, scratch_operands = 0 : i64, tpu.core_type = #tpu.core_type<tc>, window_params = [{transform_indices = @transform_0, window_bounds = array<i64: 8, 16, 32>}, {pipeline_mode = #tpu.pipeline_mode<synchronous>, transform_indices = @transform_1, window_bounds = array<i64: 16, 32>}, {transform_indices = @transform_2, window_bounds = array<i64: 8, 16, 48>}]} {
    %c0 = arith.constant 0 : index
    %c0_0 = arith.constant 0 : index
    %c0_1 = arith.constant 0 : index
    %0 = vector.load %arg1[%c0, %c0_0, %c0_1] : memref<8x16x32xf32, #tpu.memory_space<vmem>>, vector<8x16x32xf32>
    %1 = vector.extract_strided_slice %0 {offsets = [0, 0, 0], sizes = [8, 16, 16], strides = [1, 1, 1]} : vector<8x16x32xf32> to vector<8x16x16xf32>
    %2 = vector.extract_strided_slice %0 {offsets = [0, 0, 16], sizes = [8, 16, 16], strides = [1, 1, 1]} : vector<8x16x32xf32> to vector<8x16x16xf32>
    %c0_2 = arith.constant 0 : index
    %c0_3 = arith.constant 0 : index
    %3 = vector.load %arg2[%c0_2, %c0_3] : memref<16x32xf32, #tpu.memory_space<vmem>>, vector<16x32xf32>
    %cst = arith.constant dense<0.000000e+00> : vector<8x16xf32>
    %4 = vector.multi_reduction <add>, %1, %cst [2] : vector<8x16x16xf32> to vector<8x16xf32>
    %5 = vector.shape_cast %4 : vector<8x16xf32> to vector<8x16x1xf32>
    %cst_4 = arith.constant 0.000000e+00 : f32
    %6 = vector.broadcast %cst_4 : f32 to vector<8x16x1xf32>
    %7 = arith.cmpf one, %5, %6 : vector<8x16x1xf32>
    %cst_5 = arith.constant 1.000000e+00 : f32
    %8 = vector.broadcast %cst_5 : f32 to vector<8x16x1xf32>
    %9 = arith.select %7, %5, %8 : vector<8x16x1xi1>, vector<8x16x1xf32>
    %10 = math.rsqrt %9 : vector<8x16x1xf32>
    %cst_6 = arith.constant 0.000000e+00 : f32
    %11 = vector.broadcast %cst_6 : f32 to vector<8x16x1xf32>
    %12 = arith.select %7, %10, %11 : vector<8x16x1xi1>, vector<8x16x1xf32>
    %13 = vector.broadcast %12 : vector<8x16x1xf32> to vector<8x16x16xf32>
    %14 = arith.mulf %13, %2 : vector<8x16x16xf32>
    "tpu.trace_start"() <{level = 10 : i32, message = "bij,bjc->bic"}> : () -> ()
    %cst_7 = arith.constant dense<0.000000e+00> : vector<8x16x16xf32>
    %15 = tpu.matmul %1, %14, %cst_7 {dimension_numbers = #tpu.dot_dimension_numbers<[2], [1], [1], [2], [0, 0, 0, 1, 1, 2], [0], [0]>} : vector<8x16x16xf32>, vector<8x16x16xf32>, vector<8x16x16xf32> -> vector<8x16x16xf32>
    "tpu.trace_stop"() : () -> ()
    %16 = arith.addf %15, %14 : vector<8x16x16xf32>
    %17 = vector.broadcast %12 : vector<8x16x1xf32> to vector<8x16x16xf32>
    %18 = arith.mulf %17, %16 : vector<8x16x16xf32>
    %19 = vector.shape_cast %18 : vector<8x16x16xf32> to vector<128x16xf32>
    %cst_8 = arith.constant dense<0.000000e+00> : vector<128x32xf32>
    %20 = tpu.matmul %19, %3, %cst_8 {dimension_numbers = #tpu.dot_dimension_numbers<[1], [0], [0], [1], [0, 0, 1, 1], [], []>} : vector<128x16xf32>, vector<16x32xf32>, vector<128x32xf32> -> vector<128x32xf32>
    %21 = vector.shape_cast %20 : vector<128x32xf32> to vector<8x16x32xf32>
    %cst_9 = arith.constant 0.000000e+00 : f32
    %22 = vector.broadcast %cst_9 : f32 to vector<8x16x32xf32>
    %23 = arith.maximumf %21, %22 : vector<8x16x32xf32>
    %c0_10 = arith.constant 0 : index
    %c0_11 = arith.constant 0 : index
    %c0_12 = arith.constant 0 : index
    %24 = vector.load %arg3[%c0_10, %c0_11, %c0_12] : memref<8x16x48xf32, #tpu.memory_space<vmem>>, vector<8x16x16xf32>
    tpu.vector_store %arg3[%c0_10, %c0_11, %c0_12], %1 {strides = array<i32>} : memref<8x16x48xf32, #tpu.memory_space<vmem>>, vector<8x16x16xf32>,
    %c0_13 = arith.constant 0 : index
    %c0_14 = arith.constant 0 : index
    %c16 = arith.constant 16 : index
    %25 = vector.load %arg3[%c0_13, %c0_14, %c16] : memref<8x16x48xf32, #tpu.memory_space<vmem>>, vector<8x16x32xf32>
    tpu.vector_store %arg3[%c0_13, %c0_14, %c16], %23 {strides = array<i32>} : memref<8x16x48xf32, #tpu.memory_space<vmem>>, vector<8x16x32xf32>,
    return
  }
  func.func @transform_0(%arg0: i32) -> (i32, i32, i32) {
    %c0_i32 = arith.constant 0 : i32
    %c0_i32_0 = arith.constant 0 : i32
    %c0_i32_1 = arith.constant 0 : i32
    return %arg0, %c0_i32, %c0_i32_0 : i32, i32, i32
  }
  func.func @transform_1(%arg0: i32) -> (i32, i32) {
    %c0_i32 = arith.constant 0 : i32
    %c0_i32_0 = arith.constant 0 : i32
    %c0_i32_1 = arith.constant 0 : i32
    return %c0_i32, %c0_i32_0 : i32, i32
  }
  func.func @transform_2(%arg0: i32) -> (i32, i32, i32) {
    %c0_i32 = arith.constant 0 : i32
    %c0_i32_0 = arith.constant 0 : i32
    %c0_i32_1 = arith.constant 0 : i32
    return %arg0, %c0_i32, %c0_i32_0 : i32, i32, i32
  }
}

</mosaic_0001>

<bundles_post_ra>
// kernel: tpu_custom_call.1
= control target key start
LH: loop header
LB: loop body
LE: loop exit
PB: predicated region body
PF: predicated region fallthrough
CT: control target
= control target key end

     0   :  { %7 = vsyncpa [#allocation3], 0  ;;  %s3289_s0 = inlined_call_operand.hbm [shape: f32[40,512], index: 0, kind: input, shape index: {}]   ;;  %s3290_s1 = inlined_call_operand.hbm [shape: f32[16,32], index: 1, kind: input, shape index: {}]   ;;  %s3291_s2 = inlined_call_operand.hbm [shape: f32[40,768], index: 2, kind: output, shape index: {}]  }
   0x1   :  { %9 = vsyncpa [#allocation3 + $0x1], 0 }
   0x2   :  { %10 = vsyncpa [#allocation6], 0 }
   0x3   :  { %11 = vsyncpa [#allocation4], 0 }
   0x4   :  { %13 = vsyncpa [#allocation4 + $0x1], 0  ;;  %s2567_s9 = smov 0   ;;  %s2569_s10 = smov 0  }
   0x5   :  { %s2571_s11 = smov 0   ;;  %s2573_s12 = smov 0  }
   0x6 LB: > { %s2588_s13 = sadd.s32 4294967295, %s2536_s12   ;;  %s2088_s14 = sadd.s32 4294967294, %s2536_s12   ;;  %s2536_s12 = sphi %s2573_s12, %s3310_s12   ;;  %s2532_s11 = sphi %s2571_s11, %s3309_s11   ;;  %s2528_s10 = sphi %s2569_s10, %s3308_s10   ;;  %s2524_s9 = sphi %s2567_s9, %s3307_s9  }
   0x7   : > { %p39_p0 = scmp.ne.s32.totalorder %s2528_s10, %s2524_s9  ;;  %p3292_p1 = scmp.eq.s32.totalorder %s2588_s13, 0 }
   0x8   : > { %p90_p3 = scmp.eq.s32.totalorder %s2088_s14, 4  ;;  %p2089_p5 = scmp.ge.s32.totalorder %s2536_s12, 1 }
   0x9   : > { %p2597_p4 = por %p3292_p1, %p39_p0  ;;  %p97_p7 = scmp.lt.s32.totalorder %s2536_s12, 6 }
   0xa   : > { %p2602_p6 = por %p90_p3, %p39_p0  ;;  %s2538_s18 = smov [#allocation5]  }
   0xb   : > { %s3295_s15 = scalar_select %p2597_p4, 1, 0 }
   0xc   : > { %s3296_s16 = scalar_select %p2602_p6, 1, 0 }
   0xd   : > { %p2607_p8 = pnand %p2089_p5, %p97_p7  ;;  %s109_s19 = sshll.u32 %s2538_s18, 4  ;;  %s110_s19 = int_to_ptr.vmem [resolvable:$true] %s109_s19 }
   0xe   : > { %s2620_s21 = sadd.s32 1, %s2536_s12   ;;  %s26_s22 = sadd.s32 1, %s2532_s11 }
   0xf   : > { %s3297_s17 = scalar_select %p2607_p8, 1, 0 }
  0x10   : > { %p2316_p9 = pneg %p2607_p8  ;;  %s23_s23 = ssub.s32 %s2536_s12, %s2620_s21 }
  0x11   : > { %s2408_s26 = scalar_lea.hbm %s3290_s1, 256 }
  0x12   : > { %p2615_p10 = pnand %p2316_p9, %p3292_p1  ;;  %p2409_p11 = scmp.ne.s32.totalorder %s3290_s1, %s2408_s26 }
  0x13   : > { %p2415_p3 = scmp.lt.u32.totalorder %s2408_s26, %s3290_s1 }
  0x14   : > { %p2410_p12 = pneg %p2615_p10 }
  0x16   : > { %p2411_p13 = pnand %p2410_p12, %p2409_p11 }
  0x18   : > { %p2412_p0 = pneg %p2411_p13 }
  0x1a   : > { %p2417_p5 = pnand %p2415_p3, %p2412_p0 }
  0x1c   : > { %2420 = shalt.err (!%p2417_p5)
}
  0x1d   : > { %s2421_s3 = scalar_lea.vmem %s110_s19, 256  ;;  %p2429_p2 = scmp.lt.s32.totalorder %s110_s19, %s110_s19 }
  0x1e   : > { %p2422_p7 = scmp.ne.s32.totalorder %s110_s19, %s2421_s3  ;;  %p2430_p6 = scmp.lt.s32.totalorder %s2421_s3, %s2421_s3 }
  0x20   : > { %p2424_p9 = pnand %p2422_p7, %p2410_p12  ;;  %p2431_p4 = por %p2430_p6, %p2429_p2 }
  0x22   : > { %p2425_p1 = pneg %p2424_p9 }
  0x24   : > { %p2432_p8 = pnand %p2431_p4, %p2425_p1 }
  0x26   : > { %2435 = shalt.err (!%p2432_p8)
}
  0x27   : > { %s2539_s4 = smov 128   ;;  %s2540_s5 = smov 8  }
  0x28   : > { %2319 = dma.hbm_to_vmem [thread:$0]  (!%p2615_p10), %s3290_s1, 256, %s110_s19, [#allocation6], %s2539_s4, %s2539_s4, %s2540_s5  }
  0x29   : > { %p24_p11 = scmp.eq.s32.totalorder %s23_s23, 0  ;;  %p33_p2 = scmp.ne.s32.totalorder %s2532_s11, %s2528_s10 }
  0x2a   : > { %p34_p1 = scmp.eq.s32.totalorder %s2536_s12, 0  ;;  %p2329_p4 = scmp.lt.s32.totalorder %s2536_s12, 5 }
  0x2b   : > { %s2646_s8 = scalar_select %p24_p11, %s2532_s11, %s26_s22  }
  0x2c   : > { %p35_p6 = por %p34_p1, %p33_p2  ;;  %p3299_p8 = scmp.eq.s32.totalorder %s2588_s13, 4 }
  0x2d   : > { %s123_s18 = sand.u32 1, %s2532_s11   ;;  %s2133_s24 = sshll.u32 %s2536_s12, 9 }
  0x2e   : > { %p2650_p12 = por %p3299_p8, %p33_p2  ;;  %s2092_s25 = sshll.u32 %s123_s18, 5 }
  0x2f   : > { %s2659_s27 = scalar_lea.hbm %s3289_s0, %s2133_s24  ;;  %s127_s19 = scalar_lea.vmem [#allocation2], %s2092_s25 }
  0x30   : > { %s135_s22 = sshll.u32 %s127_s19, 4  ;;  %p2661_p10 = pnand %p2329_p4, %p35_p6  ;;  %s2665_s22 = int_to_ptr.vmem [resolvable:$true] %s135_s22 }
  0x31   : > { %s124_s28 = scalar_lea.sflag [#allocation3], %s123_s18  ;;  %s2436_s29 = scalar_lea.hbm %s2659_s27, 512 }
  0x32   : > { %p2437_p13 = scmp.ne.s32.totalorder %s2659_s27, %s2436_s29  ;;  %p2438_p0 = pneg %p2661_p10 }
  0x33   : > { %s2441_s4 = scalar_lea.hbm %s3289_s0, 2560  ;;  %p2442_p7 = scmp.lt.u32.totalorder %s2659_s27, %s3289_s0 }
  0x34   : > { %p2439_p3 = pnand %p2438_p0, %p2437_p13  ;;  %p2443_p9 = scmp.lt.u32.totalorder %s2441_s4, %s2436_s29 }
  0x35   : > { %p2445_p2 = scmp.lt.u32.totalorder %s2436_s29, %s2659_s27 }
  0x36   : > { %p2440_p5 = pneg %p2439_p3  ;;  %p2444_p11 = por %p2443_p9, %p2442_p7 }
  0x38   : > { %p2446_p1 = por %p2445_p2, %p2444_p11 }
  0x3a   : > { %p2447_p4 = pnand %p2446_p1, %p2440_p5 }
  0x3c   : > { %2450 = shalt.err (!%p2447_p4)
}
  0x3d   : > { %s2451_s7 = scalar_lea.vmem %s2665_s22, 512  ;;  %s2541_s18 = smov [#allocation2]  }
  0x3e   : > { %p2452_p6 = scmp.ne.s32.totalorder %s2665_s22, %s2451_s7  ;;  %s2456_s24 = sshll.u32 %s2541_s18, 4  ;;  %s2457_s24 = int_to_ptr.vmem [resolvable:$false] %s2456_s24 }
  0x3f   : > { %s2458_s25 = scalar_lea.vmem %s2457_s24, 1024  ;;  %p2459_p3 = scmp.lt.s32.totalorder %s2665_s22, %s2457_s24 }
  0x40   : > { %p2454_p8 = pnand %p2452_p6, %p2438_p0  ;;  %p2460_p7 = scmp.lt.s32.totalorder %s2458_s25, %s2451_s7 }
  0x42   : > { %p2455_p13 = pneg %p2454_p8  ;;  %p2461_p9 = por %p2460_p7, %p2459_p3 }
  0x44   : > { %p2462_p11 = pnand %p2461_p9, %p2455_p13 }
  0x46   : > { %2465 = shalt.err (!%p2462_p11)
}
  0x47   : > { %2323 = dma.hbm_to_vmem [thread:$0]  (!%p2661_p10), %s2659_s27, 512, %s2665_s22, %s124_s28  }
  0x48   : > { %p3302_p5 = scmp.ne.s32.totalorder %s3297_s17, 0 }
  0x49   : > { %s2695_s20 = sand.u32 (!%p3302_p5), 1, %s2528_s10   ;;  %p3303_p0 = scmp.ne.s32.totalorder (!%p3302_p5), %s3295_s15, 0 }
  0x4a   : > { %144 = sbr.rel (%p3302_p5) target bundleno = 1252 (0x4e4), region = 28  ;;  %s2096_s26 = sshll.u32 (!%p3302_p5), %s2695_s20, 5 }
  0x4b   : > { %s147_s19 = scalar_lea.sflag (!%p3302_p5), [#allocation3], %s2695_s20  ;;  %s150_s29 = scalar_lea.vmem (!%p3302_p5), [#allocation2], %s2096_s26 }
  0x51   : > { %2511 = dma.done.wait (%p3303_p0), %s147_s19, 512  }
  0x52   : > { %2513 = vsyncadd (%p3303_p0), %s147_s19, 4294966784  ;;  %p3304_p2 = scmp.eq.s32.totalorder %s2588_s13, 0 }
  0x54   : > { %2515 = dma.done.wait (%p3304_p2), [#allocation6], 256   ;;  %p3305_p10 = pmov %p3304_p2 }
  0x55   : > { %v2707_v0 = vld [vmem:[%s150_s29] sm:$0xff]  ;;  %s2542_s17 = smov 32   ;;  %s2543_s27 = smov 96   ;;  %v2713_v1 = vld [vmem:[%s150_s29 + $0x8] sm:$0xff]  ;;  %v2723_v2 = vld [vmem:[%s150_s29 + $0x10] sm:$0xff]  ;;  %v224_v6 = vlaneseq  ;;  %vm493_vm0 = vcmask 130048  }
  0x56   : > { %2517 = vsyncadd (%p3305_p10), [#allocation6], 4294967040  ;;  %186 = vrot.lane.b32.xlu1 %v2707_v0, %s2542_s17  ;;  %180 = vrot.lane.b32.xlu0 %v2707_v0, %s2543_s27  ;;  %s2544_s15 = smov 64   ;;  %v2729_v3 = vld [vmem:[%s150_s29 + $0x18] sm:$0xff]  ;;  %v2545_v4 = vmov 1983009808  }
  0x57   : > { %v222_v5 = vunpack.c.l.s4 %v2545_v4  ;;  %v225_v10 = vshrl.u32 %v224_v6, 7  ;;  %v2546_v12 = vmov 1934713408   ;;  %s2547_s22 = smov 112   ;;  %s2548_s23 = smov 16  }
  0x58   : > { %v286_v13 = vunpack.c.l.s4 %v2546_v12  ;;  %s2549_s28 = smov 48   ;;  %s2550_s30 = smov 80  }
  0x59   : > { %v223_v9 = vunpack.c.0.s8 %v222_v5  ;;  %s2306_s3 = smul.u32 48, %s2695_s20  ;;  %s2551_s26 = smov [#allocation7]  }
  0x5a   : > { %190 = vrot.lane.b32.xlu1 %v2713_v1, %s2543_s27  ;;  %183 = vrot.lane.b32.xlu0 %v2707_v0, %s2544_s15  ;;  %v287_v18 = vunpack.c.0.s8 %v286_v13  ;;  %s2307_s5 = smul.u32 768, %s2588_s13  ;;  %s1994_s13 = scalar_lea.sflag [#allocation4], %s2695_s20 }
  0x5b   : > { %v2747_v16 = vsub.s32 %v223_v9, %v225_v10  ;;  %s3223_s4 = scalar_lea.vmem [#allocation7], %s2306_s3  ;;  %s2470_s19 = sshll.u32 %s2551_s26, 4  ;;  %s2471_s19 = int_to_ptr.vmem [resolvable:$false] %s2470_s19 }
  0x5c   : > { %v2754_v25 = vsub.s32 %v287_v18, %v225_v10  ;;  %s2008_s6 = sshll.u32 %s3223_s4, 4  ;;  %s3244_s24 = scalar_lea.hbm %s3291_s2, %s2307_s5  ;;  %s3246_s6 = int_to_ptr.vmem [resolvable:$true] %s2008_s6 }
  0x5d   : > { %s2466_s25 = scalar_lea.vmem %s3246_s6, 768  ;;  %s2472_s29 = scalar_lea.vmem %s2471_s19, 1536 }
  0x5e   : > { %196 = vrot.lane.b32.xlu1 %v2713_v1, %s2542_s17  ;;  %193 = vrot.lane.b32.xlu0 %v2713_v1, %s2544_s15  ;;  %p2467_p1 = scmp.ne.s32.totalorder %s3246_s6, %s2466_s25  ;;  %p2473_p8 = scmp.lt.s32.totalorder %s3246_s6, %s2471_s19 }
  0x5f   : > { %p2474_p13 = scmp.lt.s32.totalorder %s2472_s29, %s2466_s25 }
  0x60   : > { %p2468_p4 = pnand %p2467_p1, %p2650_p12 }
  0x61   : > { %p2475_p3 = por %p2474_p13, %p2473_p8 }
  0x62   : > { %203 = vrot.lane.b32.xlu1 %v2723_v2, %s2544_s15  ;;  %200 = vrot.lane.b32.xlu0 %v2723_v2, %s2543_s27  ;;  %p2469_p6 = pneg %p2468_p4 }
  0x64   : > { %p2476_p7 = pnand %p2475_p3, %p2469_p6 }
  0x66   : > { %210 = vrot.lane.b32.xlu1 %v2729_v3, %s2543_s27  ;;  %206 = vrot.lane.b32.xlu0 %v2723_v2, %s2542_s17 }
  0x6a   : > { %216 = vrot.lane.b32.xlu1 %v2729_v3, %s2542_s17  ;;  %213 = vrot.lane.b32.xlu0 %v2729_v3, %s2544_s15 }
  0xc8   : > { %v2739_v7 = vpop.permute.xlu1 %186  ;;  %v2741_v8 = vpop.permute.xlu0 %180 }
  0xc9   : > { %v235_v17 = vcombine.low %v2741_v8, %v2739_v7  ;;  %v236_v56 = vcombine.high %v2741_v8, %v2739_v7 }
  0xcb   : > { %v243_v22 = vrot.slane %v235_v17, %v2747_v16 }
  0xcc   : > { %v191_v11 = vpop.permute.xlu1 %190  ;;  %v2743_v14 = vpop.permute.xlu0 %183 }
  0xcd   : > { %v219_v15 = vcombine.low %v2707_v0, %v2743_v14  ;;  %v220_v57 = vcombine.high %v2707_v0, %v2743_v14  ;;  %v250_v14 = vrot.slane %v236_v56, %v2747_v16 }
  0xcf   : > { %v227_v19 = vrot.slane %v219_v15, %v2747_v16  ;;  %v234_v9 = vrot.slane %v220_v57, %v2747_v16 }
  0xd0   : > { %v197_v20 = vpop.permute.xlu1 %196  ;;  %v194_v21 = vpop.permute.xlu0 %193 }
  0xd1   : > { %v267_v23 = vcombine.low %v191_v11, %v197_v20  ;;  %v251_v24 = vcombine.low %v2713_v1, %v194_v21  ;;  %v283_v26 = vcombine.low %v227_v19, %v243_v22  ;;  %v268_v44 = vcombine.high %v191_v11, %v197_v20 }
  0xd2   : > { %v252_v48 = vcombine.high %v2713_v1, %v194_v21  ;;  %v284_v58 = vcombine.high %v227_v19, %v243_v22 }
  0xd3   : > { %v275_v27 = vrot.slane %v267_v23, %v2747_v16  ;;  %v259_v28 = vrot.slane %v251_v24, %v2747_v16  ;;  %v291_v32 = vrot.slane %v283_v26, %v2754_v25  ;;  %v282_v59 = vrot.slane %v268_v44, %v2747_v16 }
  0xd4   : > { %v204_v29 = vpop.permute.xlu1 %203  ;;  %v201_v30 = vpop.permute.xlu0 %200  ;;  %v266_v1 = vrot.slane %v252_v48, %v2747_v16  ;;  %v298_v10 = vrot.slane %v284_v58, %v2754_v25  ;;  %v299_v23 = vcombine.low %v234_v9, %v250_v14 }
  0xd5   : > { %v315_v31 = vcombine.low %v259_v28, %v275_v27  ;;  %v355_v36 = vcombine.low %v2723_v2, %v204_v29  ;;  %v316_v49 = vcombine.high %v259_v28, %v275_v27  ;;  %v356_v4 = vcombine.high %v2723_v2, %v204_v29 }
  0xd6   : > { %v331_v15 = vcombine.low %v266_v1, %v282_v59 }
  0xd7   : > { %v323_v33 = vrot.slane %v315_v31, %v2754_v25  ;;  %v363_v45 = vrot.slane %v355_v36, %v2747_v16  ;;  %v370_v17 = vrot.slane %v356_v4, %v2747_v16 }
  0xd8   : > { %v211_v34 = vpop.permute.xlu1 %210  ;;  %v207_v35 = vpop.permute.xlu0 %206  ;;  %v339_v26 = vrot.slane %v331_v15, %v2754_v25 }
  0xd9   : > { %v371_v37 = vcombine.low %v201_v30, %v207_v35  ;;  %v2761_v38 = vcombine.low %v291_v32, %v323_v33  ;;  %v2763_v39 = vcombine.high %v291_v32, %v323_v33  ;;  %v372_v60 = vcombine.high %v201_v30, %v207_v35 }
  0xda   : > { %v307_v32 = vrot.slane %v299_v23, %v2754_v25 }
  0xdb   : > { %v379_v40 = vrot.slane %v371_v37, %v2747_v16  ;;  %2188 = vmatprep.mubr.msk.f32.mxu0 %vm493_vm0, %v2761_v38  ;;  %2195 = vmatprep.mubr.msk.f32.mxu1 %vm493_vm0, %v2763_v39  ;;  %v494_v42 = vsel %vm493_vm0, %v2761_v38, 0.0  ;;  %v500_v51 = vsel %vm493_vm0, %v2763_v39, 0.0  ;;  %v386_v11 = vrot.slane %v372_v60, %v2747_v16 }
  0xdc   : > { %v217_v41 = vpop.permute.xlu1 %216  ;;  %v214_v43 = vpop.permute.xlu0 %213  ;;  %495 = vadd.xlane.f32.xlu0 %v494_v42  ;;  %v2823_v35 = vcombine.low %v307_v32, %v339_v26  ;;  %v300_v42 = vcombine.high %v234_v9, %v250_v14 }
  0xdd   : > { %v403_v46 = vcombine.low %v211_v34, %v217_v41  ;;  %v387_v47 = vcombine.low %v2729_v3, %v214_v43  ;;  %v419_v50 = vcombine.low %v363_v45, %v379_v40  ;;  %v404_v52 = vcombine.high %v211_v34, %v217_v41 }
  0xde   : > { %v388_v54 = vcombine.high %v2729_v3, %v214_v43  ;;  %v420_v61 = vcombine.high %v363_v45, %v379_v40  ;;  %v330_v3 = vrot.slane %v316_v49, %v2754_v25  ;;  %v435_v24 = vcombine.low %v370_v17, %v386_v11 }
  0xdf   : > { %v411_v53 = vrot.slane %v403_v46, %v2747_v16  ;;  %v395_v55 = vrot.slane %v387_v47, %v2747_v16  ;;  %v427_v5 = vrot.slane %v419_v50, %v2754_v25  ;;  %v418_v6 = vrot.slane %v404_v52, %v2747_v16 }
  0xe0   : > { %501 = vadd.xlane.f32.xlu0 %v500_v51  ;;  %v402_v0 = vrot.slane %v388_v54, %v2747_v16  ;;  %v434_v12 = vrot.slane %v420_v61, %v2754_v25  ;;  %v2803_v18 = vcombine.low %v298_v10, %v330_v3  ;;  %v2812_v27 = vcombine.high %v298_v10, %v330_v3 }
  0xe1   : > { %v451_v62 = vcombine.low %v395_v55, %v411_v53  ;;  %v452_v63 = vcombine.high %v395_v55, %v411_v53  ;;  %v443_v33 = vrot.slane %v435_v24, %v2754_v25  ;;  %v332_v34 = vcombine.high %v266_v1, %v282_v59 }
  0xe2   : > { %v467_v19 = vcombine.low %v402_v0, %v418_v6  ;;  %v506_v30 = vsel %vm493_vm0, %v2803_v18, 0.0  ;;  %v468_v36 = vcombine.high %v402_v0, %v418_v6  ;;  %v512_v40 = vsel %vm493_vm0, %v2812_v27, 0.0 }
  0xe3   : > { %v459_v7 = vrot.slane %v451_v62, %v2754_v25  ;;  %v466_v8 = vrot.slane %v452_v63, %v2754_v25  ;;  %v436_v43 = vcombine.high %v370_v17, %v386_v11  ;;  %v346_v44 = vrot.slane %v332_v34, %v2754_v25 }
  0xe4   : > { %v475_v28 = vrot.slane %v467_v19, %v2754_v25  ;;  %v2832_v45 = vcombine.high %v307_v32, %v339_v26  ;;  %v482_v46 = vrot.slane %v468_v36, %v2754_v25  ;;  %v518_v48 = vsel %vm493_vm0, %v2823_v35, 0.0 }
  0xe5   : > { %v2797_v13 = vcombine.high %v427_v5, %v459_v7  ;;  %v2799_v2 = vcombine.low %v427_v5, %v459_v7  ;;  %v2809_v22 = vcombine.low %v434_v12, %v466_v8  ;;  %v2819_v31 = vcombine.high %v434_v12, %v466_v8 }
  0xe6   : > { %v2829_v41 = vcombine.low %v443_v33, %v475_v28  ;;  %v2839_v49 = vcombine.high %v443_v33, %v475_v28  ;;  %v314_v50 = vrot.slane %v300_v42, %v2754_v25  ;;  %v450_v51 = vrot.slane %v436_v43, %v2754_v25 }
  0xe7   : > { %v503_v20 = vsel %vm493_vm0, %v2797_v13, 0.0  ;;  %v497_v21 = vsel %vm493_vm0, %v2799_v2, 0.0  ;;  %v509_v29 = vsel %vm493_vm0, %v2809_v22, 0.0  ;;  %v515_v37 = vsel %vm493_vm0, %v2819_v31, 0.0 }
  0xe8   : > { %504 = vadd.xlane.f32.xlu0 %v503_v20  ;;  %498 = vadd.xlane.f32.xlu1 %v497_v21  ;;  %v521_v47 = vsel %vm493_vm0, %v2829_v41, 0.0  ;;  %v527_v52 = vsel %vm493_vm0, %v2839_v49, 0.0  ;;  %v524_v53 = vsel %vm493_vm0, %v2832_v45, 0.0  ;;  %v2847_v54 = vcombine.low %v450_v51, %v482_v46 }
  0xe9   : > { %v2849_v55 = vcombine.low %v314_v50, %v346_v44  ;;  %v2855_v58 = vcombine.high %v450_v51, %v482_v46  ;;  %v2857_v59 = vcombine.high %v314_v50, %v346_v44 }
  0xea   : > { %v533_v56 = vsel %vm493_vm0, %v2847_v54, 0.0 }
  0xeb   : > { %v530_v57 = vsel %vm493_vm0, %v2849_v55, 0.0  ;;  %v539_v60 = vsel %vm493_vm0, %v2855_v58, 0.0  ;;  %v536_v61 = vsel %vm493_vm0, %v2857_v59, 0.0 }
  0xec   : > { %510 = vadd.xlane.f32.xlu0 %v509_v29  ;;  %507 = vadd.xlane.f32.xlu1 %v506_v30 }
  0xf0   : > { %516 = vadd.xlane.f32.xlu0 %v515_v37  ;;  %513 = vadd.xlane.f32.xlu1 %v512_v40 }
  0xf4   : > { %522 = vadd.xlane.f32.xlu0 %v521_v47  ;;  %519 = vadd.xlane.f32.xlu1 %v518_v48 }
  0xf8   : > { %528 = vadd.xlane.f32.xlu0 %v527_v52  ;;  %525 = vadd.xlane.f32.xlu1 %v524_v53 }
  0xfc   : > { %534 = vadd.xlane.f32.xlu0 %v533_v56  ;;  %531 = vadd.xlane.f32.xlu1 %v530_v57 }
 0x100   : > { %540 = vadd.xlane.f32.xlu0 %v539_v60  ;;  %537 = vadd.xlane.f32.xlu1 %v536_v61 }
 0x169   : > { %v496_v62 = vpop.xlane.xlu0 %495 }
 0x16a   : > { %vm542_vm1 = vcmp.ne.f32.partialorder %v496_v62, 0.0 }
 0x16b   : > { %v558_v63 = vsel %vm542_vm1, %v496_v62, 1.0 }
 0x16c   : > { %2376 = vrsqrt.f32 %v558_v63 }
 0x16d   : > { %v502_v1 = vpop.xlane.xlu0 %501 }
 0x16e   : > { %vm544_vm2 = vcmp.ne.f32.partialorder %v502_v1, 0.0 }
 0x16f   : > { %v560_v3 = vsel %vm544_vm2, %v502_v1, 1.0 }
 0x170   : > { %2378 = vrsqrt.f32 %v560_v3 }
 0x175   : > { %v499_v4 = vpop.xlane.xlu1 %498  ;;  %v505_v5 = vpop.xlane.xlu0 %504 }
 0x176   : > { %v2377_v6 = vpop.eup %2376  ;;  %vm543_vm3 = vcmp.ne.f32.partialorder %v499_v4, 0.0  ;;  %vm545_vm4 = vcmp.ne.f32.partialorder %v505_v5, 0.0 }
 0x177   : > { %v2864_v0 = vsel %vm542_vm1, %v2377_v6, 0.0  ;;  %v559_v7 = vsel %vm543_vm3, %v499_v4, 1.0  ;;  %v561_v8 = vsel %vm545_vm4, %v505_v5, 1.0 }
 0x178   : > { %v606_v9 = vmul.f32 %v2864_v0, %v2761_v38  ;;  %2380 = vrsqrt.f32 %v559_v7 }
 0x179   : > { %2382 = vrsqrt.f32 %v561_v8  ;;  %v508_v10 = vpop.xlane.xlu1 %507  ;;  %v511_v11 = vpop.xlane.xlu0 %510 }
 0x17a   : > { %v2379_v12 = vpop.eup %2378  ;;  %vm546_vm5 = vcmp.ne.f32.partialorder %v508_v10, 0.0  ;;  %vm547_vm6 = vcmp.ne.f32.partialorder %v511_v11, 0.0  ;;  %624 = vrot.lane.b32.xlu1 %v606_v9, %s2547_s22 }
 0x17b   : > { %v2872_v14 = vsel %vm544_vm2, %v2379_v12, 0.0  ;;  %v562_v15 = vsel %vm546_vm5, %v508_v10, 1.0  ;;  %v563_v17 = vsel %vm547_vm6, %v511_v11, 1.0  ;;  %vm1967_vm2 = vcmask 392192  }
 0x17c   : > { %v608_v19 = vmul.f32 %v2872_v14, %v2763_v39  ;;  %2384 = vrsqrt.f32 %v562_v15 }
 0x17d   : > { %2386 = vrsqrt.f32 %v563_v17  ;;  %v514_v20 = vpop.xlane.xlu1 %513  ;;  %v517_v21 = vpop.xlane.xlu0 %516 }
 0x17e   : > { %vm548_vm7 = vcmp.ne.f32.partialorder %v514_v20, 0.0  ;;  %vm549_vm8 = vcmp.ne.f32.partialorder %v517_v21, 0.0  ;;  %713 = vrot.lane.b32.xlu1 %v608_v19, %s2547_s22 }
 0x17f   : > { %v564_v23 = vsel %vm548_vm7, %v514_v20, 1.0  ;;  %v565_v24 = vsel %vm549_vm8, %v517_v21, 1.0 }
 0x180   : > { %2388 = vrsqrt.f32 %v564_v23 }
 0x181   : > { %2390 = vrsqrt.f32 %v565_v24  ;;  %v520_v26 = vpop.xlane.xlu1 %519  ;;  %v523_v28 = vpop.xlane.xlu0 %522 }
 0x182   : > { %v2381_v29 = vpop.eup %2380  ;;  %vm550_vm9 = vcmp.ne.f32.partialorder %v520_v26, 0.0  ;;  %vm551_vm10 = vcmp.ne.f32.partialorder %v523_v28, 0.0 }
 0x183   : > { %v2383_v30 = vpop.eup %2382  ;;  %v2882_v32 = vsel %vm543_vm3, %v2381_v29, 0.0  ;;  %v566_v33 = vsel %vm550_vm9, %v520_v26, 1.0  ;;  %v567_v34 = vsel %vm551_vm10, %v523_v28, 1.0  ;;  %vm1969_vm3 = vcmask 785408  }
 0x184   : > { %v607_v36 = vmul.f32 %v2882_v32, %v2799_v2  ;;  %v2889_v37 = vsel %vm545_vm4, %v2383_v30, 0.0  ;;  %2392 = vrsqrt.f32 %v566_v33  ;;  %vm1972_vm4 = vcmask 523264  }
 0x185   : > { %v609_v40 = vmul.f32 %v2889_v37, %v2797_v13  ;;  %2394 = vrsqrt.f32 %v567_v34  ;;  %v526_v42 = vpop.xlane.xlu1 %525  ;;  %v529_v43 = vpop.xlane.xlu0 %528 }
 0x186   : > { %v2385_v44 = vpop.eup %2384  ;;  %vm552_vm11 = vcmp.ne.f32.partialorder %v526_v42, 0.0  ;;  %vm553_vm12 = vcmp.ne.f32.partialorder %v529_v43, 0.0  ;;  %626 = vrot.lane.b32.xlu0 %v607_v36, %s2547_s22 }
 0x187   : > { %v2387_v46 = vpop.eup %2386  ;;  %v2895_v47 = vsel %vm546_vm5, %v2385_v44, 0.0  ;;  %v568_v48 = vsel %vm552_vm11, %v526_v42, 1.0  ;;  %v569_v50 = vsel %vm553_vm12, %v529_v43, 1.0  ;;  %715 = vrot.lane.b32.xlu1 %v609_v40, %s2547_s22  ;;  %vm1974_vm5 = vcmask 916480  }
 0x188   : > { %v610_v51 = vmul.f32 %v2895_v47, %v2803_v18  ;;  %v2903_v52 = vsel %vm547_vm6, %v2387_v46, 0.0  ;;  %2396 = vrsqrt.f32 %v568_v48  ;;  %vm1976_vm6 = vcmask 261120  }
 0x189   : > { %v611_v53 = vmul.f32 %v2903_v52, %v2809_v22  ;;  %2398 = vrsqrt.f32 %v569_v50  ;;  %v532_v56 = vpop.xlane.xlu1 %531  ;;  %v535_v57 = vpop.xlane.xlu0 %534 }
 0x18a   : > { %v2389_v60 = vpop.eup %2388  ;;  %vm554_vm13 = vcmp.ne.f32.partialorder %v532_v56, 0.0  ;;  %vm555_vm14 = vcmp.ne.f32.partialorder %v535_v57, 0.0  ;;  %802 = vrot.lane.b32.xlu0 %v610_v51, %s2547_s22 }
 0x18b   : > { %v2391_v61 = vpop.eup %2390  ;;  %v2909_v62 = vsel %vm548_vm7, %v2389_v60, 0.0  ;;  %v570_v63 = vsel %vm554_vm13, %v532_v56, 1.0  ;;  %v571_v1 = vsel %vm555_vm14, %v535_v57, 1.0  ;;  %804 = vrot.lane.b32.xlu1 %v611_v53, %s2547_s22  ;;  %vm1978_vm7 = vcmask 654336  }
 0x18c   : > { %v612_v3 = vmul.f32 %v2909_v62, %v2812_v27  ;;  %v2917_v4 = vsel %vm549_vm8, %v2391_v61, 0.0  ;;  %2400 = vrsqrt.f32 %v570_v63 }
 0x18d   : > { %v613_v5 = vmul.f32 %v2917_v4, %v2819_v31  ;;  %2402 = vrsqrt.f32 %v571_v1  ;;  %v538_v6 = vpop.xlane.xlu1 %537  ;;  %v541_v7 = vpop.xlane.xlu0 %540 }
 0x18e   : > { %v2393_v8 = vpop.eup %2392  ;;  %vm556_vm15 = vcmp.ne.f32.partialorder %v538_v6, 0.0  ;;  %vm557_vm1 = vcmp.ne.f32.partialorder %v541_v7, 0.0  ;;  %891 = vrot.lane.b32.xlu0 %v612_v3, %s2547_s22 }
 0x18f   : > { %v2395_v9 = vpop.eup %2394  ;;  %v2923_v10 = vsel %vm550_vm9, %v2393_v8, 0.0  ;;  %v572_v11 = vsel %vm556_vm15, %v538_v6, 1.0  ;;  %v573_v12 = vsel %vm557_vm1, %v541_v7, 1.0  ;;  %893 = vrot.lane.b32.xlu1 %v613_v5, %s2547_s22 }
 0x190   : > { %v614_v15 = vmul.f32 %v2923_v10, %v2823_v35  ;;  %v2931_v17 = vsel %vm551_vm10, %v2395_v9, 0.0  ;;  %2404 = vrsqrt.f32 %v572_v11 }
 0x191   : > { %v615_v19 = vmul.f32 %v2931_v17, %v2829_v41  ;;  %2406 = vrsqrt.f32 %v573_v12 }
 0x192   : > { %v2397_v20 = vpop.eup %2396  ;;  %980 = vrot.lane.b32.xlu0 %v614_v15, %s2547_s22 }
 0x193   : > { %v2399_v21 = vpop.eup %2398  ;;  %v2937_v23 = vsel %vm552_vm11, %v2397_v20, 0.0  ;;  %982 = vrot.lane.b32.xlu1 %v615_v19, %s2547_s22 }
 0x194   : > { %v616_v24 = vmul.f32 %v2937_v23, %v2832_v45  ;;  %v2943_v26 = vsel %vm553_vm12, %v2399_v21, 0.0 }
 0x195   : > { %v617_v28 = vmul.f32 %v2943_v26, %v2839_v49 }
 0x196   : > { %v2401_v29 = vpop.eup %2400  ;;  %1069 = vrot.lane.b32.xlu0 %v616_v24, %s2547_s22 }
 0x197   : > { %v2403_v30 = vpop.eup %2402  ;;  %v2949_v33 = vsel %vm554_vm13, %v2401_v29, 0.0  ;;  %1071 = vrot.lane.b32.xlu1 %v617_v28, %s2547_s22 }
 0x198   : > { %v618_v34 = vmul.f32 %v2949_v33, %v2849_v55  ;;  %v2955_v36 = vsel %vm555_vm14, %v2403_v30, 0.0 }
 0x199   : > { %v619_v40 = vmul.f32 %v2955_v36, %v2847_v54 }
 0x19a   : > { %v2405_v42 = vpop.eup %2404  ;;  %1158 = vrot.lane.b32.xlu0 %v618_v34, %s2547_s22  ;;  %v491_v34 = vld [vmem:[#allocation5] sm:$0xff] }
 0x19b   : > { %v2407_v43 = vpop.eup %2406  ;;  %v2961_v44 = vsel %vm556_vm15, %v2405_v42, 0.0  ;;  %1160 = vrot.lane.b32.xlu1 %v619_v40, %s2547_s22  ;;  %v492_v40 = vld [vmem:[#allocation5 + $0x8] sm:$0xff] }
 0x19c   : > { %v620_v46 = vmul.f32 %v2961_v44, %v2857_v59  ;;  %v2967_v48 = vsel %vm557_vm1, %v2407_v43, 0.0  ;;  %v2300_v42 = vpack.c.bf16 %v492_v40, %v491_v34 }
 0x19d   : > { %v621_v50 = vmul.f32 %v2967_v48, %v2855_v58 }
 0x19e   : > { %1247 = vrot.lane.b32.xlu0 %v620_v46, %s2547_s22 }
 0x19f   : > { %1249 = vrot.lane.b32.xlu1 %v621_v50, %s2547_s22 }
 0x1ec   : > { %v2973_v51 = vpop.permute.xlu1 %624 }
 0x1f0   : > { %v2975_v53 = vpop.permute.xlu1 %713 }
 0x1f8   : > { %v627_v56 = vpop.permute.xlu0 %626 }
 0x1f9   : > { %v2977_v57 = vpop.permute.xlu1 %715  ;;  %v2268_v60 = vpack.c.bf16 %v627_v56, %v2973_v51 }
 0x1fa   : > { %v2272_v61 = vpack.c.bf16 %v2977_v57, %v2975_v53 }
 0x1fb   : > { %2269 = vmatprep.subr.bf16.mxu0 %v2268_v60 }
 0x1fc   : > { %2273 = vmatprep.subr.bf16.mxu1 %v2272_v61  ;;  %2271 = vmatpush3.bf16.msra.mxu0 %v2268_v60  ;;  %v2982_v63 = vpop.permute.xlu0 %802 }
 0x1fd   : > { %2275 = vmatpush3.bf16.msra.mxu1 %v2272_v61  ;;  %v2984_v1 = vpop.permute.xlu1 %804 }
 0x1fe   : > { %v2276_v3 = vpack.c.bf16 %v2984_v1, %v2982_v63 }
 0x1ff   : > { %2189 = vmatmul.mubr.msk.f32.vlgmr.msra.gmra.mrb[0].mxu0 %vm493_vm0, %v2799_v2 }
 0x200   : > { %2196 = vmatmul.mubr.msk.f32.vlgmr.msra.gmra.mrb[0].mxu1 %vm493_vm0, %v2797_v13  ;;  %2277 = vmatprep.subr.bf16.mxu0 %v2276_v3  ;;  %v2992_v5 = vpop.permute.xlu0 %891 }
 0x201   : > { %2209 = vmatprep.mubr.msk.f32.mxu1 %vm493_vm0, %v2812_v27  ;;  %v2996_v6 = vpop.permute.xlu1 %893  ;;  %2279 = vmatpush3.bf16.msra.mxu0 %v2276_v3 }
 0x202   : > { %2202 = vmatprep.mubr.msk.f32.mxu0 %vm493_vm0, %v2803_v18  ;;  %v2280_v7 = vpack.c.bf16 %v2996_v6, %v2992_v5 }
 0x204   : > { %2203 = vmatmul.mubr.msk.f32.vlgmr.msra.gmra.mrb[2].mxu0 %vm493_vm0, %v2809_v22  ;;  %2281 = vmatprep.subr.bf16.mxu1 %v2280_v7  ;;  %v3004_v8 = vpop.permute.xlu0 %980 }
 0x205   : > { %v3006_v9 = vpop.permute.xlu1 %982  ;;  %2283 = vmatpush3.bf16.msra.mxu1 %v2280_v7  ;;  %2216 = vmatprep.mubr.msk.f32.mxu0 %vm493_vm0, %v2823_v35 }
 0x206   : > { %v2284_v11 = vpack.c.bf16 %v3006_v9, %v3004_v8 }
 0x208   : > { %2210 = vmatmul.mubr.msk.f32.vlgmr.msra.gmra.mrb[2].mxu1 %vm493_vm0, %v2819_v31  ;;  %2285 = vmatprep.subr.bf16.mxu0 %v2284_v11  ;;  %v3014_v12 = vpop.permute.xlu0 %1069 }
 0x209   : > { %v3016_v15 = vpop.permute.xlu1 %1071  ;;  %2287 = vmatpush3.bf16.msra.mxu0 %v2284_v11  ;;  %2223 = vmatprep.mubr.msk.f32.mxu1 %vm493_vm0, %v2832_v45 }
 0x20a   : > { %v2288_v19 = vpack.c.bf16 %v3016_v15, %v3014_v12 }
 0x20c   : > { %2217 = vmatmul.mubr.msk.f32.vlgmr.msra.gmra.mrb[4].mxu0 %vm493_vm0, %v2829_v41  ;;  %2289 = vmatprep.subr.bf16.mxu1 %v2288_v19  ;;  %v3024_v20 = vpop.permute.xlu0 %1158 }
 0x20d   : > { %v3026_v21 = vpop.permute.xlu1 %1160  ;;  %2291 = vmatpush3.bf16.msra.mxu1 %v2288_v19  ;;  %2230 = vmatprep.mubr.msk.f32.mxu0 %vm493_vm0, %v2849_v55 }
 0x20e   : > { %v2292_v24 = vpack.c.bf16 %v3026_v21, %v3024_v20 }
 0x210   : > { %2224 = vmatmul.mubr.msk.f32.vlgmr.msra.gmra.mrb[4].mxu1 %vm493_vm0, %v2839_v49  ;;  %2293 = vmatprep.subr.bf16.mxu0 %v2292_v24  ;;  %v3034_v28 = vpop.permute.xlu0 %1247 }
 0x211   : > { %v3036_v29 = vpop.permute.xlu1 %1249  ;;  %2295 = vmatpush3.bf16.msra.mxu0 %v2292_v24  ;;  %2237 = vmatprep.mubr.msk.f32.mxu1 %vm493_vm0, %v2857_v59 }
 0x212   : > { %v2296_v30 = vpack.c.bf16 %v3036_v29, %v3034_v28  ;;  %2301 = vmatprep.subr.bf16.mxu0 %v2300_v42 }
 0x214   : > { %2231 = vmatmul.mubr.msk.f32.vlgmr.msra.gmra.mrb[6].mxu0 %vm493_vm0, %v2847_v54  ;;  %2297 = vmatprep.subr.bf16.mxu1 %v2296_v30 }
 0x215   : > { %2299 = vmatpush3.bf16.msra.mxu1 %v2296_v30  ;;  %2303 = vmatpush3.bf16.msra.mxu0 %v2300_v42 }
 0x216   : > { %2304 = vmatprep.subr.bf16.mxu1 %v2300_v42 }
 0x218   : > { %2238 = vmatmul.mubr.msk.f32.vlgmr.msra.gmra.mrb[6].mxu1 %vm493_vm0, %v2855_v58 }
 0x219   : > { %2305 = vmatpush3.bf16.msra.mxu1 %v2300_v42 }
 0x2d2   : > { %v2190_v43 = vpop.f32.mrb[0].mxu0 }
 0x2d3   : > { %v708_v46 = vadd.f32 %v2190_v43, %v627_v56  ;;  %v2197_v50 = vpop.f32.mrb[0].mxu1  ;;  %v702_v60 = vpop.f32.mrb[1].mxu0 }
 0x2d4   : > { %v703_v61 = vadd.f32 %v702_v60, %v2973_v51  ;;  %v791_v3 = vpop.f32.mrb[1].mxu1  ;;  %v797_v24 = vadd.f32 %v2197_v50, %v2977_v57 }
 0x2d5   : > { %v792_v7 = vadd.f32 %v791_v3, %v2975_v53  ;;  %v1335_v19 = vmul.f32 %v708_v46, %v2882_v32 }
 0x2d6   : > { %v1334_v11 = vmul.f32 %v703_v61, %v2864_v0  ;;  %v1337_v51 = vmul.f32 %v797_v24, %v2889_v37 }
 0x2d7   : > { %v2204_v30 = vpop.f32.mrb[2].mxu0  ;;  %v1336_v34 = vmul.f32 %v792_v7, %v2872_v14 }
 0x2d8   : > { %v880_v40 = vpop.f32.mrb[3].mxu0  ;;  %2244 = vmatprep.mubr.msk.f32.mxu0 %vm493_vm0, %v1334_v11  ;;  %v886_v0 = vadd.f32 %v2204_v30, %v2984_v1 }
 0x2d9   : > { %v881_v56 = vadd.f32 %v880_v40, %v2982_v63  ;;  %2245 = vmatmul.mubr.msk.f32.vlgmr.msra.gmra.mrb[8].mxu0 %vm493_vm0, %v1335_v19 }
 0x2da   : > { %2247 = vmatprep.mubr.msk.f32.mxu0 %vm493_vm0, %v1336_v34  ;;  %v1339_v14 = vmul.f32 %v886_v0, %v2903_v52 }
 0x2db   : > { %v2211_v53 = vpop.f32.mrb[2].mxu1  ;;  %v1338_v32 = vmul.f32 %v881_v56, %v2895_v47 }
 0x2dc   : > { %v969_v57 = vpop.f32.mrb[3].mxu1  ;;  %v975_v63 = vadd.f32 %v2211_v53, %v2996_v6 }
 0x2dd   : > { %v970_v42 = vadd.f32 %v969_v57, %v2992_v5  ;;  %2248 = vmatmul.mubr.msk.f32.gmra.mrb[10].mxu0 %vm493_vm0, %v1337_v51 }
 0x2de   : > { %2250 = vmatprep.mubr.msk.f32.mxu0 %vm493_vm0, %v1338_v32  ;;  %v1341_v47 = vmul.f32 %v975_v63, %v2917_v4 }
 0x2df   : > { %v2218_v43 = vpop.f32.mrb[4].mxu0  ;;  %v1340_v46 = vmul.f32 %v970_v42, %v2909_v62 }
 0x2e0   : > { %v1064_v37 = vadd.f32 %v2218_v43, %v3006_v9  ;;  %v1058_v1 = vpop.f32.mrb[5].mxu0 }
 0x2e1   : > { %v1059_v50 = vadd.f32 %v1058_v1, %v3004_v8  ;;  %2251 = vmatmul.mubr.msk.f32.gmra.mrb[12].mxu0 %vm493_vm0, %v1339_v14 }
 0x2e2   : > { %2253 = vmatprep.mubr.msk.f32.mxu0 %vm493_vm0, %v1340_v46  ;;  %v1343_v52 = vmul.f32 %v1064_v37, %v2931_v17 }
 0x2e3   : > { %v1342_v5 = vmul.f32 %v1059_v50, %v2923_v10  ;;  %v2225_v60 = vpop.f32.mrb[4].mxu1 }
 0x2e4   : > { %v1153_v6 = vadd.f32 %v2225_v60, %v3016_v15  ;;  %v1147_v61 = vpop.f32.mrb[5].mxu1 }
 0x2e5   : > { %v1148_v62 = vadd.f32 %v1147_v61, %v3014_v12  ;;  %2256 = vmatprep.mubr.msk.f32.mxu1 %vm493_vm0, %v1342_v5  ;;  %2254 = vmatmul.mubr.msk.f32.gmra.mrb[14].mxu0 %vm493_vm0, %v1341_v47 }
 0x2e6   : > { %2257 = vmatmul.mubr.msk.f32.vlgmr.msra.gmra.mrb[8].mxu1 %vm493_vm0, %v1343_v52  ;;  %v1345_v4 = vmul.f32 %v1153_v6, %v2943_v26 }
 0x2e7   : > { %v1344_v8 = vmul.f32 %v1148_v62, %v2937_v23  ;;  %v2232_v9 = vpop.f32.mrb[6].mxu0 }
 0x2e8   : > { %v1242_v10 = vadd.f32 %v2232_v9, %v3026_v21  ;;  %v1236_v3 = vpop.f32.mrb[7].mxu0 }
 0x2e9   : > { %v1237_v17 = vadd.f32 %v1236_v3, %v3024_v20  ;;  %2259 = vmatprep.mubr.msk.f32.mxu1 %vm493_vm0, %v1344_v8 }
 0x2ea   : > { %2260 = vmatmul.mubr.msk.f32.gmra.mrb[10].mxu1 %vm493_vm0, %v1345_v4  ;;  %v1347_v7 = vmul.f32 %v1242_v10, %v2955_v36 }
 0x2eb   : > { %v1346_v12 = vmul.f32 %v1237_v17, %v2949_v33  ;;  %v2239_v15 = vpop.f32.mrb[6].mxu1 }
 0x2ec   : > { %v1331_v11 = vadd.f32 %v2239_v15, %v3036_v29  ;;  %v1325_v23 = vpop.f32.mrb[7].mxu1 }
 0x2ed   : > { %v1326_v19 = vadd.f32 %v1325_v23, %v3034_v28  ;;  %2262 = vmatprep.mubr.msk.f32.mxu1 %vm493_vm0, %v1346_v12 }
 0x2ee   : > { %2263 = vmatmul.mubr.msk.f32.gmra.mrb[12].mxu1 %vm493_vm0, %v1347_v7  ;;  %v1349_v20 = vmul.f32 %v1331_v11, %v2967_v48 }
 0x2ef   : > { %v1348_v26 = vmul.f32 %v1326_v19, %v2961_v44 }
 0x2f1   : > { %2265 = vmatprep.mubr.msk.f32.mxu1 %vm493_vm0, %v1348_v26 }
 0x2f2   : > { %2266 = vmatmul.mubr.msk.f32.gmra.mrb[14].mxu1 %vm493_vm0, %v1349_v20 }
 0x3ac   : > { %v2246_v33 = vpop.f32.mrb[8].mxu0 }
 0x3ad   : > { %v1544_v21 = vmax.f32 %v2246_v33, 0.0  ;;  %v1464_v36 = vpop.f32.mrb[9].mxu0 }
 0x3ae   : > { %v1543_v24 = vmax.f32 %v1464_v36, 0.0 }
 0x3af   : > { %1577 = vrot.lane.b32.xlu1 %v1544_v21, %s2548_s23 }
 0x3b0   : > { %1575 = vrot.lane.b32.xlu0 %v1543_v24, %s2548_s23  ;;  %v2249_v28 = vpop.f32.mrb[10].mxu0 }
 0x3b1   : > { %v1546_v29 = vmax.f32 %v2249_v28, 0.0  ;;  %v1474_v30 = vpop.f32.mrb[11].mxu0 }
 0x3b2   : > { %v1545_v34 = vmax.f32 %v1474_v30, 0.0 }
 0x3b3   : > { %1581 = vrot.lane.b32.xlu1 %v1546_v29, %s2548_s23 }
 0x3b4   : > { %1579 = vrot.lane.b32.xlu0 %v1545_v34, %s2548_s23  ;;  %v2252_v44 = vpop.f32.mrb[12].mxu0 }
 0x3b5   : > { %v1548_v48 = vmax.f32 %v2252_v44, 0.0  ;;  %v1484_v40 = vpop.f32.mrb[13].mxu0 }
 0x3b6   : > { %v1547_v56 = vmax.f32 %v1484_v40, 0.0 }
 0x3b7   : > { %1585 = vrot.lane.b32.xlu1 %v1548_v48, %s2548_s23 }
 0x3b8   : > { %1583 = vrot.lane.b32.xlu0 %v1547_v56, %s2548_s23  ;;  %v2255_v51 = vpop.f32.mrb[14].mxu0 }
 0x3b9   : > { %v2258_v0 = vpop.f32.mrb[8].mxu1  ;;  %v1494_v53 = vpop.f32.mrb[15].mxu0  ;;  %v1550_v63 = vmax.f32 %v2255_v51, 0.0 }
 0x3ba   : > { %v1552_v32 = vmax.f32 %v2258_v0, 0.0  ;;  %v1504_v57 = vpop.f32.mrb[9].mxu1  ;;  %v1549_v46 = vmax.f32 %v1494_v53, 0.0 }
 0x3bb   : > { %v1551_v42 = vmax.f32 %v1504_v57, 0.0 }
 0x3bc   : > { %1593 = vrot.lane.b32.xlu1 %v1552_v32, %s2548_s23 }
 0x3bd   : > { %1591 = vrot.lane.b32.xlu0 %v1551_v42, %s2548_s23  ;;  %v2261_v14 = vpop.f32.mrb[10].mxu1 }
 0x3be   : > { %v1514_v43 = vpop.f32.mrb[11].mxu1  ;;  %v1554_v1 = vmax.f32 %v2261_v14, 0.0 }
 0x3bf   : > { %v1553_v47 = vmax.f32 %v1514_v43, 0.0 }
 0x3c0   : > { %1589 = vrot.lane.b32.xlu1 %v1550_v63, %s2548_s23 }
 0x3c1   : > { %1587 = vrot.lane.b32.xlu0 %v1549_v46, %s2548_s23  ;;  %v2264_v37 = vpop.f32.mrb[12].mxu1 }
 0x3c2   : > { %v1524_v50 = vpop.f32.mrb[13].mxu1  ;;  %v1556_v60 = vmax.f32 %v2264_v37, 0.0 }
 0x3c3   : > { %v1555_v6 = vmax.f32 %v1524_v50, 0.0 }
 0x3c4   : > { %1597 = vrot.lane.b32.xlu1 %v1554_v1, %s2548_s23 }
 0x3c5   : > { %1595 = vrot.lane.b32.xlu0 %v1553_v47, %s2548_s23  ;;  %v2267_v5 = vpop.f32.mrb[14].mxu1 }
 0x3c6   : > { %v1534_v52 = vpop.f32.mrb[15].mxu1  ;;  %v1558_v61 = vmax.f32 %v2267_v5, 0.0 }
 0x3c7   : > { %v1557_v62 = vmax.f32 %v1534_v52, 0.0 }
 0x3c8   : > { %1601 = vrot.lane.b32.xlu1 %v1556_v60, %s2548_s23 }
 0x3c9   : > { %1599 = vrot.lane.b32.xlu0 %v1555_v6, %s2548_s23 }
 0x3cc   : > { %1605 = vrot.lane.b32.xlu1 %v1558_v61, %s2548_s23 }
 0x3cd   : > { %1603 = vrot.lane.b32.xlu0 %v1557_v62, %s2548_s23 }
 0x421   : > { %v1578_v8 = vpop.permute.xlu1 %1577 }
 0x422   : > { %v1576_v9 = vpop.permute.xlu0 %1575  ;;  %v1624_v36 = vsel %vm493_vm0, %v2799_v2, %v1578_v8 }
 0x425   : > { %v1582_v4 = vpop.permute.xlu1 %1581 }
 0x426   : > { %v1580_v10 = vpop.permute.xlu0 %1579  ;;  %v1626_v20 = vsel %vm493_vm0, %v2797_v13, %v1582_v4 }
 0x427   : > { %v3133_v2 = vsel %vm493_vm0, %v2763_v39, %v1580_v10 }
 0x429   : > { %v1586_v3 = vpop.permute.xlu1 %1585 }
 0x42a   : > { %v1584_v17 = vpop.permute.xlu0 %1583  ;;  %v1628_v33 = vsel %vm493_vm0, %v2809_v22, %v1586_v3  ;;  %v3129_v22 = vsel %vm493_vm0, %v2761_v38, %v1576_v9 }
 0x42b   : > { %v1775_v29 = vcombine.low %v1624_v36, %v1628_v33 }
 0x42e   : > { %v1594_v12 = vpop.permute.xlu1 %1593 }
 0x42f   : > { %v1592_v15 = vpop.permute.xlu0 %1591 }
 0x430   : > { %v1631_v39 = vsel %vm493_vm0, %v2823_v35, %v1592_v15 }
 0x432   : > { %v1590_v7 = vpop.permute.xlu1 %1589 }
 0x433   : > { %v1588_v11 = vpop.permute.xlu0 %1587  ;;  %v1630_v23 = vsel %vm493_vm0, %v2819_v31, %v1590_v7  ;;  %v3123_v31 = vsel %vm493_vm0, %v2803_v18, %v1584_v17  ;;  %v1632_v18 = vsel %vm493_vm0, %v2829_v41, %v1594_v12 }
 0x434   : > { %v1791_v21 = vcombine.low %v1626_v20, %v1630_v23  ;;  %v3119_v24 = vsel %vm493_vm0, %v2812_v27, %v1588_v11  ;;  %v1776_v27 = vcombine.high %v1624_v36, %v1628_v33  ;;  %v1792_v44 = vcombine.high %v1626_v20, %v1630_v23 }
 0x435   : > { %v1655_v48 = vcombine.low %v3133_v2, %v3119_v24  ;;  %v1639_v38 = vcombine.low %v3129_v22, %v3123_v31 }
 0x436   : > { %v1598_v19 = vpop.permute.xlu1 %1597  ;;  %v1806_v63 = vrot.slane %v1792_v44, %v2747_v16 }
 0x437   : > { %v1596_v26 = vpop.permute.xlu0 %1595  ;;  %v1634_v41 = vsel %vm493_vm0, %v2839_v49, %v1598_v19  ;;  %v1663_v46 = vrot.slane %v1655_v48, %v2747_v16  ;;  %v1647_v5 = vrot.slane %v1639_v38, %v2747_v16 }
 0x438   : > { %v1633_v57 = vsel %vm493_vm0, %v2832_v45, %v1596_v26  ;;  %v1790_v45 = vrot.slane %v1776_v27, %v2747_v16  ;;  %v1656_v26 = vcombine.high %v3133_v2, %v3119_v24 }
 0x439   : > { %v1703_v9 = vcombine.low %v1647_v5, %v1663_v46  ;;  %v1704_v44 = vcombine.high %v1647_v5, %v1663_v46 }
 0x43a   : > { %v1602_v28 = vpop.permute.xlu1 %1601  ;;  %v1855_v8 = vcombine.low %v1790_v45, %v1806_v63  ;;  %v1856_v19 = vcombine.high %v1790_v45, %v1806_v63 }
 0x43b   : > { %v1636_v13 = vsel %vm493_vm0, %v2847_v54, %v1602_v28  ;;  %v1600_v30 = vpop.permute.xlu0 %1599  ;;  %v1799_v54 = vrot.slane %v1791_v21, %v2747_v16  ;;  %v3187_v36 = vrot.slane %v1703_v9, %v2754_v25  ;;  %v1640_v28 = vcombine.high %v3129_v22, %v3123_v31 }
 0x43c   : > { %v3137_v34 = vsel %vm493_vm0, %v2849_v55, %v1600_v30  ;;  %v1807_v40 = vcombine.low %v1632_v18, %v1636_v13  ;;  %v1808_v56 = vcombine.high %v1632_v18, %v1636_v13  ;;  %v1783_v55 = vrot.slane %v1775_v29, %v2747_v16 }
 0x43d   : > { %v1671_v0 = vcombine.low %v1631_v39, %v3137_v34  ;;  %v1672_v33 = vcombine.high %v1631_v39, %v3137_v34  ;;  %v1863_v21 = vrot.slane %v1855_v8, %v2754_v25  ;;  %v1670_v18 = vrot.slane %v1656_v26, %v2747_v16 }
 0x43e   : > { %v1606_v51 = vpop.permute.xlu1 %1605  ;;  %v1840_v43 = vcombine.high %v1783_v55, %v1799_v54  ;;  %v1815_v37 = vrot.slane %v1807_v40, %v2747_v16  ;;  %v1822_v1 = vrot.slane %v1808_v56, %v2747_v16  ;;  %v1839_v61 = vcombine.low %v1783_v55, %v1799_v54 }
 0x43f   : > { %v1638_v53 = vsel %vm493_vm0, %v2855_v58, %v1606_v51  ;;  %v1604_v32 = vpop.permute.xlu0 %1603  ;;  %v1679_v47 = vrot.slane %v1671_v0, %v2747_v16  ;;  %v1686_v31 = vrot.slane %v1672_v33, %v2747_v16  ;;  %v1870_v22 = vrot.slane %v1856_v19, %v2754_v25 }
 0x440   : > { %v1823_v42 = vcombine.low %v1634_v41, %v1638_v53  ;;  %v1824_v14 = vcombine.high %v1634_v41, %v1638_v53  ;;  %v1637_v35 = vsel %vm493_vm0, %v2857_v59, %v1604_v32  ;;  %v1854_v4 = vrot.slane %v1840_v43, %v2754_v25 }
 0x441   : > { %v1687_v49 = vcombine.low %v1633_v57, %v1637_v35  ;;  %v1688_v17 = vcombine.high %v1633_v57, %v1637_v35  ;;  %v3180_v20 = vrot.slane %v1839_v61, %v2754_v25  ;;  %v1654_v54 = vrot.slane %v1640_v28, %v2747_v16 }
 0x442   : > { %v1831_v58 = vrot.slane %v1823_v42, %v2747_v16  ;;  %v1838_v50 = vrot.slane %v1824_v14, %v2747_v16  ;;  %v1718_v51 = vrot.slane %v1704_v44, %v2754_v25 }
 0x443   : > { %v1695_v59 = vrot.slane %v1687_v49, %v2747_v16  ;;  %v1702_v29 = vrot.slane %v1688_v17, %v2747_v16  ;;  %v1719_v56 = vcombine.low %v1654_v54, %v1670_v18  ;;  %v1720_v32 = vcombine.high %v1654_v54, %v1670_v18 }
 0x444   : > { %v1871_v60 = vcombine.low %v1815_v37, %v1831_v58  ;;  %v1872_v52 = vcombine.high %v1815_v37, %v1831_v58  ;;  %v1887_v6 = vcombine.low %v1822_v1, %v1838_v50  ;;  %v1888_v3 = vcombine.high %v1822_v1, %v1838_v50 }
 0x445   : > { %v1735_v62 = vcombine.low %v1679_v47, %v1695_v59  ;;  %v1736_v24 = vcombine.high %v1679_v47, %v1695_v59  ;;  %v1751_v48 = vcombine.low %v1686_v31, %v1702_v29  ;;  %v1752_v55 = vcombine.high %v1686_v31, %v1702_v29 }
 0x446   : > { %v1886_v10 = vrot.slane %v1872_v52, %v2754_v25  ;;  %v3171_v12 = vrot.slane %v1871_v60, %v2754_v25  ;;  %v1895_v11 = vrot.slane %v1887_v6, %v2754_v25  ;;  %v1902_v27 = vrot.slane %v1888_v3, %v2754_v25 }
 0x447   : > { %v3175_v23 = vrot.slane %v1735_v62, %v2754_v25  ;;  %v1750_v40 = vrot.slane %v1736_v24, %v2754_v25  ;;  %v1759_v53 = vrot.slane %v1751_v48, %v2754_v25  ;;  %v1727_v16 = vrot.slane %v1719_v56, %v2754_v25 }
 0x448   : > { %v1906_v15 = vcombine.high %v1854_v4, %v1886_v10  ;;  %v1905_v7 = vcombine.low %v1854_v4, %v1886_v10  ;;  %v1903_v13 = vcombine.low %v3180_v20, %v3171_v12  ;;  %v1907_v30 = vcombine.low %v1863_v21, %v1895_v11 }
 0x449   : > { %v1904_v2 = vcombine.high %v3180_v20, %v3171_v12  ;;  %v1767_v34 = vcombine.low %v3187_v36, %v3175_v23  ;;  %v1909_v38 = vcombine.low %v1870_v22, %v1902_v27  ;;  %v1908_v39 = vcombine.high %v1863_v21, %v1895_v11 }
 0x44a   : > { %1948 = vrot.lane.b32.xlu1 %v1906_v15, %s2548_s23  ;;  %1944 = vrot.lane.b32.xlu0 %v1905_v7, %s2543_s27  ;;  %v1770_v41 = vcombine.high %v1718_v51, %v1750_v40  ;;  %v1769_v0 = vcombine.low %v1718_v51, %v1750_v40  ;;  %v1771_v57 = vcombine.low %v1727_v16, %v1759_v53 }
 0x44b   : > { %v1768_v42 = vcombine.high %v3187_v36, %v3175_v23  ;;  %v1766_v14 = vrot.slane %v1752_v55, %v2754_v25  ;;  %v1734_v35 = vrot.slane %v1720_v32, %v2754_v25  ;;  %v1772_v43 = vcombine.high %v1727_v16, %v1759_v53 }
 0x44c   : > { %v1910_v46 = vcombine.high %v1870_v22, %v1902_v27 }
 0x44d   : > { %v1773_v63 = vcombine.low %v1734_v35, %v1766_v14  ;;  %v1774_v49 = vcombine.high %v1734_v35, %v1766_v14 }
 0x44e   : > { %1952 = vrot.lane.b32.xlu1 %v1907_v30, %s2544_s15  ;;  %1940 = vrot.lane.b32.xlu0 %v1904_v2, %s2549_s28 }
 0x452   : > { %1960 = vrot.lane.b32.xlu1 %v1909_v38, %s2542_s17  ;;  %1956 = vrot.lane.b32.xlu0 %v1908_v39, %s2547_s22 }
 0x456   : > { %1920 = vrot.lane.b32.xlu1 %v1770_v41, %s2548_s23  ;;  %1916 = vrot.lane.b32.xlu0 %v1769_v0, %s2543_s27 }
 0x45a   : > { %1924 = vrot.lane.b32.xlu1 %v1771_v57, %s2544_s15  ;;  %1912 = vrot.lane.b32.xlu0 %v1768_v42, %s2549_s28 }
 0x45e   : > { %1932 = vrot.lane.b32.xlu1 %v1773_v63, %s2542_s17  ;;  %1928 = vrot.lane.b32.xlu0 %v1772_v43, %s2547_s22 }
 0x462   : > { %1964 = vrot.lane.b32.xlu1 %v1910_v46, %s2550_s30  ;;  %1936 = vrot.lane.b32.xlu0 %v1774_v49, %s2550_s30 }
 0x4bc   : > { %v1949_v37 = vpop.permute.xlu1 %1948  ;;  %v1945_v1 = vpop.permute.xlu0 %1944 }
 0x4bd   : > { %v1982_v47 = vsel %vm493_vm0, %v1945_v1, %v1949_v37 }
 0x4c0   : > { %v1953_v58 = vpop.permute.xlu1 %1952  ;;  %v1941_v50 = vpop.permute.xlu0 %1940 }
 0x4c1   : > { %v1980_v25 = vsel %vm1967_vm2, %v1903_v13, %v1941_v50  ;;  %v1983_v59 = vsel %vm1972_vm4, %v1982_v47, %v1953_v58 }
 0x4c2   : > { %v1981_v45 = vsel %vm1969_vm3, %v1980_v25, %v1945_v1 }
 0x4c3   : > { %1990 = vst [vmem:[%s3223_s4 + $0x18] sm:$0xff] %v1981_v45 }
 0x4c4   : > { %v1961_v5 = vpop.permute.xlu1 %1960  ;;  %v1957_v60 = vpop.permute.xlu0 %1956 }
 0x4c5   : > { %v1984_v52 = vsel %vm1974_vm5, %v1983_v59, %v1957_v60  ;;  %v1985_v7 = vsel %vm1976_vm6, %v1957_v60, %v1961_v5 }
 0x4c6   : > { %1991 = vst [vmem:[%s3223_s4 + $0x20] sm:$0xff] %v1984_v52 }
 0x4c8   : > { %v1921_v6 = vpop.permute.xlu1 %1920  ;;  %v1917_v61 = vpop.permute.xlu0 %1916 }
 0x4c9   : > { %v1971_v10 = vsel %vm493_vm0, %v1917_v61, %v1921_v6 }
 0x4cc   : > { %v1925_v62 = vpop.permute.xlu1 %1924  ;;  %v1913_v8 = vpop.permute.xlu0 %1912 }
 0x4cd   : > { %v1968_v9 = vsel %vm1967_vm2, %v1767_v34, %v1913_v8  ;;  %v1973_v3 = vsel %vm1972_vm4, %v1971_v10, %v1925_v62 }
 0x4ce   : > { %v1970_v4 = vsel %vm1969_vm3, %v1968_v9, %v1917_v61 }
 0x4cf   : > { %1987 = vst [vmem:[%s3223_s4] sm:$0xff] %v1970_v4 }
 0x4d0   : > { %v1933_v17 = vpop.permute.xlu1 %1932  ;;  %v1929_v12 = vpop.permute.xlu0 %1928 }
 0x4d1   : > { %v1975_v15 = vsel %vm1974_vm5, %v1973_v3, %v1929_v12  ;;  %v1977_v11 = vsel %vm1976_vm6, %v1929_v12, %v1933_v17 }
 0x4d2   : > { %1988 = vst [vmem:[%s3223_s4 + $0x8] sm:$0xff] %v1975_v15 }
 0x4d4   : > { %v1965_v23 = vpop.permute.xlu1 %1964  ;;  %v1937_v19 = vpop.permute.xlu0 %1936 }
 0x4d5   : > { %v1986_v26 = vsel %vm1978_vm7, %v1985_v7, %v1965_v23  ;;  %v1979_v20 = vsel %vm1978_vm7, %v1977_v11, %v1937_v19 }
 0x4d6   : > { %1992 = vst [vmem:[%s3223_s4 + $0x28] sm:$0xff] %v1986_v26  ;;  %1989 = vst [vmem:[%s3223_s4 + $0x10] sm:$0xff] %v1979_v20 }
 0x4d7   : > { %2479 = shalt.err (!%p2476_p7)
}
 0x4d8   : > { %s2480_s20 = scalar_lea.hbm %s3244_s24, 768  ;;  %s2484_s15 = scalar_lea.hbm %s3291_s2, 3840 }
 0x4d9   : > { %p2481_p9 = scmp.ne.s32.totalorder %s3244_s24, %s2480_s20  ;;  %p2485_p0 = scmp.lt.u32.totalorder %s3244_s24, %s3291_s2 }
 0x4da   : > { %p2486_p2 = scmp.lt.u32.totalorder %s2484_s15, %s2480_s20  ;;  %p2488_p1 = scmp.lt.u32.totalorder %s2480_s20, %s3244_s24 }
 0x4db   : > { %p2482_p11 = pnand %p2481_p9, %p2650_p12 }
 0x4dc   : > { %p2487_p10 = por %p2486_p2, %p2485_p0 }
 0x4dd   : > { %p2483_p5 = pneg %p2482_p11 }
 0x4de   : > { %p2489_p4 = por %p2488_p1, %p2487_p10 }
 0x4e0   : > { %p2490_p6 = pnand %p2489_p4, %p2483_p5 }
 0x4e2   : > { %2493 = shalt.err (!%p2490_p6)
}
 0x4e3   : > { %2314 = dma.vmem_to_hbm [thread:$0]  (%p2650_p12), %s3246_s6, 768, %s3244_s24, %s1994_s13  }
 0x4e4 PF: > { %p2331_p8 = scmp.ge.s32.totalorder %s2536_s12, 2  ;;  %s2020_s28 = sand.u32 1, %s2524_s9  }
 0x4e5   : > { %p3306_p13 = scmp.ne.s32.totalorder %s3296_s16, 0  ;;  %s2021_s30 = scalar_lea.sflag [#allocation4], %s2020_s28 }
 0x4e7   : > { %p2325_p3 = pnand %p2331_p8, %p3306_p13 }
 0x4e9   : > { %2519 = dma.done.wait (!%p2325_p3), %s2021_s30, 768  }
 0x4ea   : > { %2521 = vsyncadd (!%p2325_p3), %s2021_s30, 4294966528  ;;  %p16_p7 = scmp.ge.s32.totalorder %s2620_s21, 7   ;;  %s3307_s9 = smov %s2528_s10 }
 0x4eb   : > { %s3308_s10 = smov %s2532_s11  ;;  %s3309_s11 = smov %s2646_s8 }
 0x4ec   : > { %s3310_s12 = smov %s2620_s21  ;;  %18 = sbr.rel (!%p16_p7) target bundleno = 6 (0x6), region = 77 }
 0x4f3   :  { %2026 = vsyncpa [#allocation3], 1 }
 0x4f4   :  { %2028 = vsyncpa [#allocation3 + $0x1], 1 }
 0x4f5   :  { %2029 = vsyncpa [#allocation6], 1 }
 0x4f6   :  { %2030 = vsyncpa [#allocation4], 1 }
 0x4f7   :  { %2032 = vsyncpa [#allocation4 + $0x1], 1 }

// kernel: tpu_custom_call.1
= control target key start
LH: loop header
LB: loop body
LE: loop exit
PB: predicated region body
PF: predicated region fallthrough
CT: control target
= control target key end

     0   :  { %7 = vsyncpa [#allocation3], 0  ;;  %s2331_s0 = inlined_call_operand.vmem [shape: f32[40,16,32], index: 0, kind: input, shape index: {}]   ;;  %s2332_s1 = inlined_call_operand.vmem [shape: f32[16,32], index: 1, kind: input, shape index: {}]   ;;  %s2333_s2 = inlined_call_operand.hbm [shape: f32[40,16,48], index: 2, kind: output, shape index: {}]  }
   0x1   :  { %9 = vsyncpa [#allocation3 + $0x1], 0  ;;  %s1786_s9 = smov 0   ;;  %s1788_s10 = smov 0  }
   0x2   :  { %s1790_s11 = smov 0   ;;  %s1792_s12 = smov 0  }
   0x3 LB: > { %s1807_s13 = sadd.s32 4294967295, %s1764_s12   ;;  %s1406_s14 = sadd.s32 4294967294, %s1764_s12   ;;  %s1764_s12 = sphi %s1792_s12, %s2339_s12   ;;  %s1760_s11 = sphi %s1790_s11, %s2338_s11   ;;  %s1756_s10 = sphi %s1788_s10, %s2337_s10   ;;  %s1752_s9 = sphi %s1786_s9, %s2336_s9  }
   0x4   : > { %s1811_s15 = sadd.s32 1, %s1764_s12   ;;  %s69_s16 = sadd.s32 1, %s1760_s11 }
   0x5   : > { %s66_s17 = ssub.s32 %s1764_s12, %s1811_s15  ;;  %p79_p0 = scmp.ne.s32.totalorder %s1760_s11, %s1756_s10 }
   0x6   : > { %p67_p1 = scmp.eq.s32.totalorder %s66_s17, 0  ;;  %p80_p2 = scmp.eq.s32.totalorder %s1807_s13, 4 }
   0x7   : > { %p85_p3 = scmp.ne.s32.totalorder %s1756_s10, %s1752_s9  ;;  %p86_p4 = scmp.eq.s32.totalorder %s1406_s14, 4 }
   0x8   : > { %s1822_s18 = scalar_select %p67_p1, %s1760_s11, %s69_s16  }
   0x9   : > { %p1824_p5 = por %p80_p2, %p79_p0  ;;  %p1828_p6 = por %p86_p4, %p85_p3 }
   0xa   : > { %p1409_p7 = scmp.ge.s32.totalorder %s1764_s12, 1  ;;  %p117_p8 = scmp.lt.s32.totalorder %s1764_s12, 6 }
   0xc   : > { %p118_p9 = pnand %p1409_p7, %p117_p8 }
   0xd   : > { %s1411_s21 = sshll.u32 (!%p118_p9), %s1807_s13, 3  ;;  %vm166_vm0 = vcmask (!%p118_p9), 130048   ;;  %s1766_s26 = smov (!%p118_p9), 112  }
   0xe   : > { %121 = sbr.rel (%p118_p9) target bundleno = 908 (0x38c), region = 28  ;;  %p141_p10 = scmp.lt.s32.totalorder (!%p118_p9), %s1411_s21, 39 }
   0xf   : > { %s137_s3 = sand.u32 (!%p118_p9), 1, %s1756_s10   ;;  %s1767_s6 = smov (!%p118_p9), 16  }
  0x10   : > { %s1410_s4 = sshll.u32 (!%p118_p9), %s137_s3, 7  ;;  %s1454_s7 = sshll.u32 (!%p118_p9), %s1807_s13, 11 }
  0x11   : > { %s2181_s5 = scalar_lea.vmem (!%p118_p9), [#allocation2], %s1410_s4  ;;  %s2280_s17 = scalar_lea.hbm (!%p118_p9), %s2333_s2, %s1454_s7 }
  0x12   : > { %s1344_s8 = sshll.u32 (!%p118_p9), %s2181_s5, 4  ;;  %s2290_s13 = scalar_lea.sflag (!%p118_p9), [#allocation3], %s137_s3  ;;  %s2282_s8 = int_to_ptr.vmem [resolvable:$true] %s1344_s8 }
  0x15   : > { %s2341_s21 = smov (!%p141_p10, %s1411_s21), 39 }
  0x16   : > { %s1452_s22 = sshll.u32 %s2341_s21, 4  ;;  %s1702_s21 = scalar_lea.vmem %s2282_s8, 2048 }
  0x17   : > { %s1838_s25 = scalar_lea.vmem %s2331_s0, %s1452_s22  ;;  %p1703_p11 = scmp.ne.s32.totalorder %s2282_s8, %s1702_s21 }
  0x18   : > { %v1841_v0 = vld [vmem:[%s1838_s25 + $0x10] sm:$0xff]  ;;  %v1844_v1 = vld [vmem:[%s1838_s25] sm:$0xff]  ;;  %v1847_v2 = vld [vmem:[%s1838_s25 + $0x18] sm:$0xff]  ;;  %s1768_s22 = smov [#allocation2]  }
  0x19   : > { %v173_v3 = vsel %vm166_vm0, %v1841_v0, 0.0  ;;  %v167_v4 = vsel %vm166_vm0, %v1844_v1, 0.0  ;;  %v1854_v5 = vld [vmem:[%s1838_s25 + $0x8] sm:$0xff]  ;;  %1509 = vmatprep.mubr.msk.f32.mxu0 %vm166_vm0, %v1844_v1  ;;  %1516 = vmatprep.mubr.msk.f32.mxu1 %vm166_vm0, %v1841_v0  ;;  %v176_v6 = vsel %vm166_vm0, %v1847_v2, 0.0  ;;  %v1868_v9 = vld [vmem:[%s1838_s25 + $0x20] sm:$0xff]  ;;  %v1875_v12 = vld [vmem:[%s1838_s25 + $0x38] sm:$0xff]  ;;  %p1704_p12 = pnand %p1703_p11, %p1824_p5 }
  0x1a   : > { %174 = vadd.xlane.f32.xlu1 %v173_v3  ;;  %168 = vadd.xlane.f32.xlu0 %v167_v4  ;;  %v170_v7 = vsel %vm166_vm0, %v1854_v5, 0.0  ;;  %v1865_v8 = vld [vmem:[%s1838_s25 + $0x28] sm:$0xff]  ;;  %v179_v11 = vsel %vm166_vm0, %v1868_v9, 0.0  ;;  %v1878_v13 = vld [vmem:[%s1838_s25 + $0x30] sm:$0xff]  ;;  %v188_v14 = vsel %vm166_vm0, %v1875_v12, 0.0  ;;  %v1888_v17 = vld [vmem:[%s1838_s25 + $0x40] sm:$0xff] }
  0x1b   : > { %v182_v10 = vsel %vm166_vm0, %v1865_v8, 0.0  ;;  %v185_v15 = vsel %vm166_vm0, %v1878_v13, 0.0  ;;  %v1885_v16 = vld [vmem:[%s1838_s25 + $0x48] sm:$0xff]  ;;  %v191_v19 = vsel %vm166_vm0, %v1888_v17, 0.0  ;;  %v1895_v20 = vld [vmem:[%s1838_s25 + $0x58] sm:$0xff]  ;;  %v1898_v21 = vld [vmem:[%s1838_s25 + $0x50] sm:$0xff]  ;;  %p1705_p13 = pneg %p1704_p12 }
  0x1c   : > { %v194_v18 = vsel %vm166_vm0, %v1885_v16, 0.0  ;;  %v200_v22 = vsel %vm166_vm0, %v1895_v20, 0.0  ;;  %v197_v23 = vsel %vm166_vm0, %v1898_v21, 0.0  ;;  %v1905_v24 = vld [vmem:[%s1838_s25 + $0x68] sm:$0xff]  ;;  %v1908_v25 = vld [vmem:[%s1838_s25 + $0x60] sm:$0xff]  ;;  %v1915_v28 = vld [vmem:[%s1838_s25 + $0x78] sm:$0xff] }
  0x1d   : > { %v206_v26 = vsel %vm166_vm0, %v1905_v24, 0.0  ;;  %v203_v27 = vsel %vm166_vm0, %v1908_v25, 0.0  ;;  %v1918_v29 = vld [vmem:[%s1838_s25 + $0x70] sm:$0xff]  ;;  %v212_v30 = vsel %vm166_vm0, %v1915_v28, 0.0  ;;  %1233 = vst.msk [vmem:[%s2181_s5 + $0x8] sm:$0xff] %vm166_vm0, %v1854_v5  ;;  %1232 = vst.msk [vmem:[%s2181_s5] sm:$0xff] %vm166_vm0, %v1844_v1 }
  0x1e   : > { %177 = vadd.xlane.f32.xlu1 %v176_v6  ;;  %171 = vadd.xlane.f32.xlu0 %v170_v7  ;;  %v209_v31 = vsel %vm166_vm0, %v1918_v29, 0.0  ;;  %1234 = vst.msk [vmem:[%s2181_s5 + $0x10] sm:$0xff] %vm166_vm0, %v1841_v0  ;;  %1235 = vst.msk [vmem:[%s2181_s5 + $0x18] sm:$0xff] %vm166_vm0, %v1847_v2  ;;  %s1706_s23 = sshll.u32 %s1768_s22, 4  ;;  %s1707_s23 = int_to_ptr.vmem [resolvable:$false] %s1706_s23 }
  0x1f   : > { %1236 = vst.msk [vmem:[%s2181_s5 + $0x20] sm:$0xff] %vm166_vm0, %v1868_v9  ;;  %1237 = vst.msk [vmem:[%s2181_s5 + $0x28] sm:$0xff] %vm166_vm0, %v1865_v8  ;;  %s1708_s24 = scalar_lea.vmem %s1707_s23, 4096  ;;  %p1709_p0 = scmp.lt.s32.totalorder %s2282_s8, %s1707_s23 }
  0x20   : > { %1238 = vst.msk [vmem:[%s2181_s5 + $0x30] sm:$0xff] %vm166_vm0, %v1878_v13  ;;  %1239 = vst.msk [vmem:[%s2181_s5 + $0x38] sm:$0xff] %vm166_vm0, %v1875_v12  ;;  %p1710_p1 = scmp.lt.s32.totalorder %s1708_s24, %s1702_s21 }
  0x21   : > { %1240 = vst.msk [vmem:[%s2181_s5 + $0x40] sm:$0xff] %vm166_vm0, %v1888_v17  ;;  %1241 = vst.msk [vmem:[%s2181_s5 + $0x48] sm:$0xff] %vm166_vm0, %v1885_v16 }
  0x22   : > { %183 = vadd.xlane.f32.xlu1 %v182_v10  ;;  %180 = vadd.xlane.f32.xlu0 %v179_v11  ;;  %1242 = vst.msk [vmem:[%s2181_s5 + $0x50] sm:$0xff] %vm166_vm0, %v1898_v21  ;;  %1243 = vst.msk [vmem:[%s2181_s5 + $0x58] sm:$0xff] %vm166_vm0, %v1895_v20  ;;  %p1711_p2 = por %p1710_p1, %p1709_p0 }
  0x23   : > { %1244 = vst.msk [vmem:[%s2181_s5 + $0x60] sm:$0xff] %vm166_vm0, %v1908_v25  ;;  %1245 = vst.msk [vmem:[%s2181_s5 + $0x68] sm:$0xff] %vm166_vm0, %v1905_v24 }
  0x24   : > { %1246 = vst.msk [vmem:[%s2181_s5 + $0x70] sm:$0xff] %vm166_vm0, %v1918_v29  ;;  %1247 = vst.msk [vmem:[%s2181_s5 + $0x78] sm:$0xff] %vm166_vm0, %v1915_v28  ;;  %p1712_p3 = pnand %p1711_p2, %p1705_p13 }
  0x26   : > { %189 = vadd.xlane.f32.xlu1 %v188_v14  ;;  %186 = vadd.xlane.f32.xlu0 %v185_v15 }
  0x2a   : > { %195 = vadd.xlane.f32.xlu1 %v194_v18  ;;  %192 = vadd.xlane.f32.xlu0 %v191_v19 }
  0x2e   : > { %201 = vadd.xlane.f32.xlu1 %v200_v22  ;;  %198 = vadd.xlane.f32.xlu0 %v197_v23 }
  0x32   : > { %207 = vadd.xlane.f32.xlu1 %v206_v26  ;;  %204 = vadd.xlane.f32.xlu0 %v203_v27 }
  0x36   : > { %213 = vadd.xlane.f32.xlu1 %v212_v30  ;;  %210 = vadd.xlane.f32.xlu0 %v209_v31 }
  0xa7   : > { %v175_v32 = vpop.xlane.xlu1 %174  ;;  %v169_v33 = vpop.xlane.xlu0 %168 }
  0xa8   : > { %vm217_vm1 = vcmp.ne.f32.partialorder %v175_v32, 0.0  ;;  %vm215_vm2 = vcmp.ne.f32.partialorder %v169_v33, 0.0 }
  0xa9   : > { %v231_v34 = vsel %vm215_vm2, %v169_v33, 1.0  ;;  %v233_v35 = vsel %vm217_vm1, %v175_v32, 1.0 }
  0xaa   : > { %1670 = vrsqrt.f32 %v231_v34 }
  0xab   : > { %v178_v36 = vpop.xlane.xlu1 %177  ;;  %v172_v37 = vpop.xlane.xlu0 %171  ;;  %1672 = vrsqrt.f32 %v233_v35 }
  0xac   : > { %vm218_vm3 = vcmp.ne.f32.partialorder %v178_v36, 0.0  ;;  %vm216_vm4 = vcmp.ne.f32.partialorder %v172_v37, 0.0 }
  0xad   : > { %v232_v38 = vsel %vm216_vm4, %v172_v37, 1.0  ;;  %v234_v39 = vsel %vm218_vm3, %v178_v36, 1.0 }
  0xae   : > { %1674 = vrsqrt.f32 %v232_v38 }
  0xaf   : > { %v1928_v40 = vpop.xlane.xlu1 %183  ;;  %v181_v41 = vpop.xlane.xlu0 %180  ;;  %1676 = vrsqrt.f32 %v234_v39 }
  0xb0   : > { %vm220_vm5 = vcmp.ne.f32.partialorder %v1928_v40, 0.0  ;;  %vm219_vm6 = vcmp.ne.f32.partialorder %v181_v41, 0.0 }
  0xb1   : > { %v235_v42 = vsel %vm219_vm6, %v181_v41, 1.0  ;;  %v236_v43 = vsel %vm220_vm5, %v1928_v40, 1.0 }
  0xb2   : > { %1678 = vrsqrt.f32 %v235_v42 }
  0xb3   : > { %v1935_v44 = vpop.xlane.xlu1 %189  ;;  %v187_v45 = vpop.xlane.xlu0 %186  ;;  %1680 = vrsqrt.f32 %v236_v43 }
  0xb4   : > { %vm222_vm7 = vcmp.ne.f32.partialorder %v1935_v44, 0.0  ;;  %vm221_vm8 = vcmp.ne.f32.partialorder %v187_v45, 0.0  ;;  %v1671_v46 = vpop.eup %1670 }
  0xb5   : > { %v237_v47 = vsel %vm221_vm8, %v187_v45, 1.0  ;;  %v1940_v48 = vsel %vm215_vm2, %v1671_v46, 0.0  ;;  %v238_v50 = vsel %vm222_vm7, %v1935_v44, 1.0  ;;  %v1673_v53 = vpop.eup %1672 }
  0xb6   : > { %v279_v49 = vmul.f32 %v1940_v48, %v1844_v1  ;;  %1682 = vrsqrt.f32 %v237_v47  ;;  %v1963_v62 = vsel %vm217_vm1, %v1673_v53, 0.0 }
  0xb7   : > { %v1947_v51 = vpop.xlane.xlu1 %195  ;;  %v193_v52 = vpop.xlane.xlu0 %192  ;;  %1684 = vrsqrt.f32 %v238_v50  ;;  %v281_v6 = vmul.f32 %v1963_v62, %v1841_v0 }
  0xb8   : > { %vm224_vm9 = vcmp.ne.f32.partialorder %v1947_v51, 0.0  ;;  %vm223_vm10 = vcmp.ne.f32.partialorder %v193_v52, 0.0  ;;  %v1675_v54 = vpop.eup %1674  ;;  %297 = vrot.lane.b32.xlu0 %v279_v49, %s1766_s26 }
  0xb9   : > { %v239_v55 = vsel %vm223_vm10, %v193_v52, 1.0  ;;  %v1953_v56 = vsel %vm216_vm4, %v1675_v54, 0.0  ;;  %v240_v58 = vsel %vm224_vm9, %v1947_v51, 1.0  ;;  %v1677_v61 = vpop.eup %1676 }
  0xba   : > { %v280_v57 = vmul.f32 %v1953_v56, %v1854_v5  ;;  %1686 = vrsqrt.f32 %v239_v55  ;;  %v1979_v18 = vsel %vm218_vm3, %v1677_v61, 0.0 }
  0xbb   : > { %v1960_v59 = vpop.xlane.xlu1 %201  ;;  %v199_v60 = vpop.xlane.xlu0 %198  ;;  %1688 = vrsqrt.f32 %v240_v58  ;;  %v282_v26 = vmul.f32 %v1979_v18, %v1847_v2 }
  0xbc   : > { %vm226_vm11 = vcmp.ne.f32.partialorder %v1960_v59, 0.0  ;;  %vm225_vm12 = vcmp.ne.f32.partialorder %v199_v60, 0.0  ;;  %v1679_v63 = vpop.eup %1678  ;;  %299 = vrot.lane.b32.xlu1 %v280_v57, %s1766_s26 }
  0xbd   : > { %v241_v3 = vsel %vm225_vm12, %v199_v60, 1.0  ;;  %v1969_v4 = vsel %vm219_vm6, %v1679_v63, 0.0  ;;  %v242_v10 = vsel %vm226_vm11, %v1960_v59, 1.0  ;;  %v1681_v15 = vpop.eup %1680 }
  0xbe   : > { %v283_v7 = vmul.f32 %v1969_v4, %v1868_v9  ;;  %1690 = vrsqrt.f32 %v241_v3  ;;  %v1994_v34 = vsel %vm220_vm5, %v1681_v15, 0.0 }
  0xbf   : > { %v208_v11 = vpop.xlane.xlu1 %207  ;;  %v205_v14 = vpop.xlane.xlu0 %204  ;;  %1692 = vrsqrt.f32 %v242_v10  ;;  %v284_v38 = vmul.f32 %v1994_v34, %v1865_v8 }
  0xc0   : > { %vm228_vm13 = vcmp.ne.f32.partialorder %v208_v11, 0.0  ;;  %vm227_vm14 = vcmp.ne.f32.partialorder %v205_v14, 0.0  ;;  %v1683_v19 = vpop.eup %1682  ;;  %386 = vrot.lane.b32.xlu1 %v281_v6, %s1766_s26  ;;  %475 = vrot.lane.b32.xlu0 %v283_v7, %s1766_s26 }
  0xc1   : > { %v243_v22 = vsel %vm227_vm14, %v205_v14, 1.0  ;;  %v1985_v23 = vsel %vm221_vm8, %v1683_v19, 0.0  ;;  %v244_v30 = vsel %vm228_vm13, %v208_v11, 1.0  ;;  %v1685_v33 = vpop.eup %1684 }
  0xc2   : > { %v285_v27 = vmul.f32 %v1985_v23, %v1878_v13  ;;  %1694 = vrsqrt.f32 %v243_v22  ;;  %v2008_v41 = vsel %vm222_vm7, %v1685_v33, 0.0 }
  0xc3   : > { %v214_v31 = vpop.xlane.xlu1 %213  ;;  %v211_v32 = vpop.xlane.xlu0 %210  ;;  %1696 = vrsqrt.f32 %v244_v30  ;;  %v286_v46 = vmul.f32 %v2008_v41, %v1875_v12 }
  0xc4   : > { %vm229_vm15 = vcmp.ne.f32.partialorder %v211_v32, 0.0  ;;  %v1687_v35 = vpop.eup %1686  ;;  %vm230_vm1 = vcmp.ne.f32.partialorder %v214_v31, 0.0  ;;  %388 = vrot.lane.b32.xlu1 %v282_v26, %s1766_s26  ;;  %564 = vrot.lane.b32.xlu0 %v285_v27, %s1766_s26 }
  0xc5   : > { %v245_v36 = vsel %vm229_vm15, %v211_v32, 1.0  ;;  %v2000_v37 = vsel %vm223_vm10, %v1687_v35, 0.0  ;;  %v1689_v40 = vpop.eup %1688  ;;  %v246_v42 = vsel %vm230_vm1, %v214_v31, 1.0 }
  0xc6   : > { %v287_v39 = vmul.f32 %v2000_v37, %v1888_v17  ;;  %1698 = vrsqrt.f32 %v245_v36  ;;  %v2022_v49 = vsel %vm224_vm9, %v1689_v40, 0.0 }
  0xc7   : > { %1700 = vrsqrt.f32 %v246_v42  ;;  %v288_v53 = vmul.f32 %v2022_v49, %v1885_v16 }
  0xc8   : > { %v1691_v43 = vpop.eup %1690  ;;  %477 = vrot.lane.b32.xlu1 %v284_v38, %s1766_s26  ;;  %653 = vrot.lane.b32.xlu0 %v287_v39, %s1766_s26 }
  0xc9   : > { %v2014_v45 = vsel %vm225_vm12, %v1691_v43, 0.0  ;;  %v1693_v44 = vpop.eup %1692 }
  0xca   : > { %v289_v47 = vmul.f32 %v2014_v45, %v1898_v21  ;;  %v2035_v51 = vsel %vm226_vm11, %v1693_v44, 0.0 }
  0xcb   : > { %v290_v60 = vmul.f32 %v2035_v51, %v1895_v20 }
  0xcc   : > { %v1695_v50 = vpop.eup %1694  ;;  %566 = vrot.lane.b32.xlu1 %v286_v46, %s1766_s26  ;;  %742 = vrot.lane.b32.xlu0 %v289_v47, %s1766_s26 }
  0xcd   : > { %v2027_v52 = vsel %vm227_vm14, %v1695_v50, 0.0  ;;  %v1697_v55 = vpop.eup %1696 }
  0xce   : > { %v291_v54 = vmul.f32 %v2027_v52, %v1908_v25  ;;  %v2047_v63 = vsel %vm228_vm13, %v1697_v55, 0.0  ;;  %v165_v55 = vld [vmem:[%s2332_s1 + $0x8] sm:$0xff] }
  0xcf   : > { %v292_v3 = vmul.f32 %v2047_v63, %v1905_v24 }
  0xd0   : > { %v1699_v57 = vpop.eup %1698  ;;  %655 = vrot.lane.b32.xlu1 %v288_v53, %s1766_s26  ;;  %831 = vrot.lane.b32.xlu0 %v291_v54, %s1766_s26  ;;  %v164_v54 = vld [vmem:[%s2332_s1] sm:$0xff] }
  0xd1   : > { %v2040_v58 = vsel %vm229_vm15, %v1699_v57, 0.0  ;;  %v1701_v59 = vpop.eup %1700  ;;  %v1621_v57 = vpack.c.bf16 %v165_v55, %v164_v54 }
  0xd2   : > { %v293_v61 = vmul.f32 %v2040_v58, %v1918_v29  ;;  %v2054_v6 = vsel %vm230_vm1, %v1701_v59, 0.0 }
  0xd3   : > { %v294_v7 = vmul.f32 %v2054_v6, %v1915_v28 }
  0xd4   : > { %744 = vrot.lane.b32.xlu1 %v290_v60, %s1766_s26  ;;  %920 = vrot.lane.b32.xlu0 %v293_v61, %s1766_s26 }
  0xd8   : > { %833 = vrot.lane.b32.xlu1 %v292_v3, %s1766_s26 }
  0xdc   : > { %922 = vrot.lane.b32.xlu1 %v294_v7, %s1766_s26 }
 0x12a   : > { %v2060_v10 = vpop.permute.xlu0 %297 }
 0x12e   : > { %v300_v11 = vpop.permute.xlu1 %299 }
 0x12f   : > { %v1589_v14 = vpack.c.bf16 %v300_v11, %v2060_v10 }
 0x131   : > { %1590 = vmatprep.subr.bf16.mxu0 %v1589_v14 }
 0x132   : > { %v2063_v15 = vpop.permute.xlu1 %386  ;;  %1592 = vmatpush3.bf16.msra.mxu0 %v1589_v14  ;;  %v2065_v19 = vpop.permute.xlu0 %475 }
 0x135   : > { %1510 = vmatmul.mubr.msk.f32.vlgmr.msra.gmra.mrb[0].mxu0 %vm166_vm0, %v1854_v5 }
 0x136   : > { %v389_v22 = vpop.permute.xlu1 %388  ;;  %v2069_v26 = vpop.permute.xlu0 %564  ;;  %1523 = vmatprep.mubr.msk.f32.mxu0 %vm166_vm0, %v1868_v9 }
 0x137   : > { %v1593_v27 = vpack.c.bf16 %v389_v22, %v2063_v15 }
 0x139   : > { %1594 = vmatprep.subr.bf16.mxu1 %v1593_v27 }
 0x13a   : > { %1596 = vmatpush3.bf16.msra.mxu1 %v1593_v27  ;;  %v478_v30 = vpop.permute.xlu1 %477  ;;  %v2075_v32 = vpop.permute.xlu0 %653 }
 0x13b   : > { %v1597_v31 = vpack.c.bf16 %v478_v30, %v2065_v19 }
 0x13d   : > { %1517 = vmatmul.mubr.msk.f32.vlgmr.msra.gmra.mrb[0].mxu1 %vm166_vm0, %v1847_v2  ;;  %1598 = vmatprep.subr.bf16.mxu0 %v1597_v31 }
 0x13e   : > { %v2079_v33 = vpop.permute.xlu1 %566  ;;  %1600 = vmatpush3.bf16.msra.mxu0 %v1597_v31  ;;  %1530 = vmatprep.mubr.msk.f32.mxu1 %vm166_vm0, %v1878_v13  ;;  %v2087_v36 = vpop.permute.xlu0 %742 }
 0x13f   : > { %v1601_v35 = vpack.c.bf16 %v2079_v33, %v2069_v26 }
 0x141   : > { %1524 = vmatmul.mubr.msk.f32.vlgmr.msra.gmra.mrb[2].mxu0 %vm166_vm0, %v1865_v8  ;;  %1602 = vmatprep.subr.bf16.mxu1 %v1601_v35 }
 0x142   : > { %v2089_v38 = vpop.permute.xlu1 %655  ;;  %1604 = vmatpush3.bf16.msra.mxu1 %v1601_v35  ;;  %1537 = vmatprep.mubr.msk.f32.mxu0 %vm166_vm0, %v1888_v17  ;;  %v2103_v43 = vpop.permute.xlu0 %831 }
 0x143   : > { %v1605_v39 = vpack.c.bf16 %v2089_v38, %v2075_v32 }
 0x145   : > { %1531 = vmatmul.mubr.msk.f32.vlgmr.msra.gmra.mrb[2].mxu1 %vm166_vm0, %v1875_v12  ;;  %1606 = vmatprep.subr.bf16.mxu0 %v1605_v39 }
 0x146   : > { %v2097_v40 = vpop.permute.xlu1 %744  ;;  %1608 = vmatpush3.bf16.msra.mxu0 %v1605_v39  ;;  %1544 = vmatprep.mubr.msk.f32.mxu1 %vm166_vm0, %v1898_v21  ;;  %v2115_v44 = vpop.permute.xlu0 %920 }
 0x147   : > { %v1609_v42 = vpack.c.bf16 %v2097_v40, %v2087_v36 }
 0x149   : > { %1538 = vmatmul.mubr.msk.f32.vlgmr.msra.gmra.mrb[4].mxu0 %vm166_vm0, %v1885_v16  ;;  %1610 = vmatprep.subr.bf16.mxu1 %v1609_v42 }
 0x14a   : > { %v2107_v46 = vpop.permute.xlu1 %833  ;;  %1612 = vmatpush3.bf16.msra.mxu1 %v1609_v42  ;;  %1551 = vmatprep.mubr.msk.f32.mxu0 %vm166_vm0, %v1908_v25 }
 0x14b   : > { %v1613_v47 = vpack.c.bf16 %v2107_v46, %v2103_v43 }
 0x14d   : > { %1545 = vmatmul.mubr.msk.f32.vlgmr.msra.gmra.mrb[4].mxu1 %vm166_vm0, %v1895_v20  ;;  %1614 = vmatprep.subr.bf16.mxu0 %v1613_v47 }
 0x14e   : > { %v2117_v50 = vpop.permute.xlu1 %922  ;;  %1616 = vmatpush3.bf16.msra.mxu0 %v1613_v47  ;;  %1558 = vmatprep.mubr.msk.f32.mxu1 %vm166_vm0, %v1918_v29 }
 0x14f   : > { %v1617_v53 = vpack.c.bf16 %v2117_v50, %v2115_v44  ;;  %1622 = vmatprep.subr.bf16.mxu0 %v1621_v57 }
 0x151   : > { %1552 = vmatmul.mubr.msk.f32.vlgmr.msra.gmra.mrb[6].mxu0 %vm166_vm0, %v1905_v24  ;;  %1618 = vmatprep.subr.bf16.mxu1 %v1617_v53 }
 0x152   : > { %1620 = vmatpush3.bf16.msra.mxu1 %v1617_v53  ;;  %1624 = vmatpush3.bf16.msra.mxu0 %v1621_v57 }
 0x153   : > { %1625 = vmatprep.subr.bf16.mxu1 %v1621_v57 }
 0x155   : > { %1559 = vmatmul.mubr.msk.f32.vlgmr.msra.gmra.mrb[6].mxu1 %vm166_vm0, %v1915_v28 }
 0x156   : > { %1626 = vmatpush3.bf16.msra.mxu1 %v1621_v57 }
 0x208   : > { %v1511_v60 = vpop.f32.mrb[0].mxu0 }
 0x209   : > { %v381_v61 = vadd.f32 %v1511_v60, %v300_v11  ;;  %v375_v59 = vpop.f32.mrb[1].mxu0 }
 0x20a   : > { %v376_v3 = vadd.f32 %v375_v59, %v2060_v10 }
 0x20b   : > { %v1008_v14 = vmul.f32 %v381_v61, %v1953_v56 }
 0x20c   : > { %v1007_v7 = vmul.f32 %v376_v3, %v1940_v48 }
 0x20e   : > { %1565 = vmatprep.mubr.msk.f32.mxu0 %vm166_vm0, %v1007_v7 }
 0x20f   : > { %1566 = vmatmul.mubr.msk.f32.vlgmr.msra.gmra.mrb[8].mxu0 %vm166_vm0, %v1008_v14 }
 0x210   : > { %v1518_v27 = vpop.f32.mrb[0].mxu1 }
 0x211   : > { %v470_v31 = vadd.f32 %v1518_v27, %v389_v22  ;;  %v464_v35 = vpop.f32.mrb[1].mxu1 }
 0x212   : > { %v465_v39 = vadd.f32 %v464_v35, %v2063_v15 }
 0x213   : > { %v1010_v11 = vmul.f32 %v470_v31, %v1979_v18 }
 0x214   : > { %v1009_v42 = vmul.f32 %v465_v39, %v1963_v62  ;;  %v1525_v47 = vpop.f32.mrb[2].mxu0 }
 0x215   : > { %v559_v53 = vadd.f32 %v1525_v47, %v478_v30  ;;  %v553_v10 = vpop.f32.mrb[3].mxu0 }
 0x216   : > { %v554_v48 = vadd.f32 %v553_v10, %v2065_v19  ;;  %1568 = vmatprep.mubr.msk.f32.mxu0 %vm166_vm0, %v1009_v42 }
 0x217   : > { %1569 = vmatmul.mubr.msk.f32.gmra.mrb[10].mxu0 %vm166_vm0, %v1010_v11  ;;  %v1012_v22 = vmul.f32 %v559_v53, %v1994_v34 }
 0x218   : > { %v1011_v56 = vmul.f32 %v554_v48, %v1969_v4  ;;  %v1532_v54 = vpop.f32.mrb[2].mxu1 }
 0x219   : > { %v648_v15 = vadd.f32 %v1532_v54, %v2079_v33  ;;  %v642_v55 = vpop.f32.mrb[3].mxu1 }
 0x21a   : > { %v643_v62 = vadd.f32 %v642_v55, %v2069_v26  ;;  %1571 = vmatprep.mubr.msk.f32.mxu0 %vm166_vm0, %v1011_v56 }
 0x21b   : > { %1572 = vmatmul.mubr.msk.f32.gmra.mrb[12].mxu0 %vm166_vm0, %v1012_v22  ;;  %v1014_v30 = vmul.f32 %v648_v15, %v2008_v41 }
 0x21c   : > { %v1013_v18 = vmul.f32 %v643_v62, %v1985_v23  ;;  %v1539_v19 = vpop.f32.mrb[4].mxu0 }
 0x21d   : > { %v737_v57 = vadd.f32 %v1539_v19, %v2089_v38  ;;  %v731_v4 = vpop.f32.mrb[5].mxu0 }
 0x21e   : > { %v732_v60 = vadd.f32 %v731_v4, %v2075_v32  ;;  %1574 = vmatprep.mubr.msk.f32.mxu0 %vm166_vm0, %v1013_v18 }
 0x21f   : > { %1575 = vmatmul.mubr.msk.f32.gmra.mrb[14].mxu0 %vm166_vm0, %v1014_v30  ;;  %v1016_v33 = vmul.f32 %v737_v57, %v2022_v49 }
 0x220   : > { %v1015_v34 = vmul.f32 %v732_v60, %v2000_v37  ;;  %v1546_v26 = vpop.f32.mrb[4].mxu1 }
 0x221   : > { %v826_v61 = vadd.f32 %v1546_v26, %v2097_v40  ;;  %v820_v23 = vpop.f32.mrb[5].mxu1 }
 0x222   : > { %v821_v59 = vadd.f32 %v820_v23, %v2087_v36  ;;  %1577 = vmatprep.mubr.msk.f32.mxu1 %vm166_vm0, %v1015_v34 }
 0x223   : > { %1578 = vmatmul.mubr.msk.f32.vlgmr.msra.gmra.mrb[8].mxu1 %vm166_vm0, %v1016_v33  ;;  %v1018_v38 = vmul.f32 %v826_v61, %v2035_v51 }
 0x224   : > { %v1017_v41 = vmul.f32 %v821_v59, %v2014_v45  ;;  %v1553_v32 = vpop.f32.mrb[6].mxu0 }
 0x225   : > { %v915_v3 = vadd.f32 %v1553_v32, %v2107_v46  ;;  %v909_v37 = vpop.f32.mrb[7].mxu0 }
 0x226   : > { %v910_v49 = vadd.f32 %v909_v37, %v2103_v43  ;;  %1580 = vmatprep.mubr.msk.f32.mxu1 %vm166_vm0, %v1017_v41 }
 0x227   : > { %1581 = vmatmul.mubr.msk.f32.gmra.mrb[10].mxu1 %vm166_vm0, %v1018_v38  ;;  %v1020_v7 = vmul.f32 %v915_v3, %v2047_v63 }
 0x228   : > { %v1019_v36 = vmul.f32 %v910_v49, %v2027_v52  ;;  %v1560_v40 = vpop.f32.mrb[6].mxu1 }
 0x229   : > { %v1004_v45 = vadd.f32 %v1560_v40, %v2117_v50  ;;  %v998_v14 = vpop.f32.mrb[7].mxu1 }
 0x22a   : > { %v999_v51 = vadd.f32 %v998_v14, %v2115_v44  ;;  %1583 = vmatprep.mubr.msk.f32.mxu1 %vm166_vm0, %v1019_v36 }
 0x22b   : > { %1584 = vmatmul.mubr.msk.f32.gmra.mrb[12].mxu1 %vm166_vm0, %v1020_v7  ;;  %v1022_v46 = vmul.f32 %v1004_v45, %v2054_v6 }
 0x22c   : > { %v1021_v43 = vmul.f32 %v999_v51, %v2040_v58 }
 0x22e   : > { %1586 = vmatprep.mubr.msk.f32.mxu1 %vm166_vm0, %v1021_v43 }
 0x22f   : > { %1587 = vmatmul.mubr.msk.f32.gmra.mrb[14].mxu1 %vm166_vm0, %v1022_v46  ;;  %vm1312_vm0 = vcmask 392320  }
 0x2e2   : > { %v1567_v0 = vpop.f32.mrb[8].mxu0 }
 0x2e3   : > { %v1217_v1 = vmax.f32 %v1567_v0, 0.0  ;;  %v1137_v2 = vpop.f32.mrb[9].mxu0 }
 0x2e4   : > { %v1216_v5 = vmax.f32 %v1137_v2, 0.0 }
 0x2e5   : > { %1266 = vrot.lane.b32.xlu1 %v1217_v1, %s1767_s6 }
 0x2e6   : > { %1264 = vrot.lane.b32.xlu0 %v1216_v5, %s1767_s6 }
 0x2ea   : > { %v1570_v8 = vpop.f32.mrb[10].mxu0 }
 0x2eb   : > { %v1219_v9 = vmax.f32 %v1570_v8, 0.0  ;;  %v1147_v12 = vpop.f32.mrb[11].mxu0 }
 0x2ec   : > { %v1218_v13 = vmax.f32 %v1147_v12, 0.0 }
 0x2ed   : > { %1270 = vrot.lane.b32.xlu1 %v1219_v9, %s1767_s6 }
 0x2ee   : > { %1268 = vrot.lane.b32.xlu0 %v1218_v13, %s1767_s6  ;;  %v1573_v16 = vpop.f32.mrb[12].mxu0 }
 0x2ef   : > { %v1221_v17 = vmax.f32 %v1573_v16, 0.0  ;;  %v1157_v20 = vpop.f32.mrb[13].mxu0 }
 0x2f0   : > { %v1220_v21 = vmax.f32 %v1157_v20, 0.0 }
 0x2f1   : > { %1274 = vrot.lane.b32.xlu1 %v1221_v17, %s1767_s6 }
 0x2f2   : > { %1272 = vrot.lane.b32.xlu0 %v1220_v21, %s1767_s6  ;;  %v1576_v24 = vpop.f32.mrb[14].mxu0 }
 0x2f3   : > { %v1167_v25 = vpop.f32.mrb[15].mxu0  ;;  %v1223_v6 = vmax.f32 %v1576_v24, 0.0 }
 0x2f4   : > { %v1222_v50 = vmax.f32 %v1167_v25, 0.0 }
 0x2f6   : > { %v1579_v28 = vpop.f32.mrb[8].mxu1 }
 0x2f7   : > { %v1225_v29 = vmax.f32 %v1579_v28, 0.0  ;;  %v1177_v52 = vpop.f32.mrb[9].mxu1 }
 0x2f8   : > { %v1224_v58 = vmax.f32 %v1177_v52, 0.0 }
 0x2f9   : > { %1282 = vrot.lane.b32.xlu1 %v1225_v29, %s1767_s6 }
 0x2fa   : > { %1280 = vrot.lane.b32.xlu0 %v1224_v58, %s1767_s6  ;;  %v1582_v63 = vpop.f32.mrb[10].mxu1 }
 0x2fb   : > { %v1187_v44 = vpop.f32.mrb[11].mxu1  ;;  %v1227_v31 = vmax.f32 %v1582_v63, 0.0 }
 0x2fc   : > { %v1226_v39 = vmax.f32 %v1187_v44, 0.0 }
 0x2fd   : > { %1278 = vrot.lane.b32.xlu1 %v1223_v6, %s1767_s6 }
 0x2fe   : > { %1276 = vrot.lane.b32.xlu0 %v1222_v50, %s1767_s6  ;;  %v1585_v27 = vpop.f32.mrb[12].mxu1 }
 0x2ff   : > { %v1197_v35 = vpop.f32.mrb[13].mxu1  ;;  %v1229_v47 = vmax.f32 %v1585_v27, 0.0 }
 0x300   : > { %v1228_v53 = vmax.f32 %v1197_v35, 0.0 }
 0x301   : > { %1286 = vrot.lane.b32.xlu1 %v1227_v31, %s1767_s6 }
 0x302   : > { %1284 = vrot.lane.b32.xlu0 %v1226_v39, %s1767_s6  ;;  %v1588_v42 = vpop.f32.mrb[14].mxu1 }
 0x303   : > { %v1207_v11 = vpop.f32.mrb[15].mxu1  ;;  %v1231_v10 = vmax.f32 %v1588_v42, 0.0 }
 0x304   : > { %v1230_v48 = vmax.f32 %v1207_v11, 0.0 }
 0x305   : > { %1290 = vrot.lane.b32.xlu1 %v1229_v47, %s1767_s6 }
 0x306   : > { %1288 = vrot.lane.b32.xlu0 %v1228_v53, %s1767_s6 }
 0x309   : > { %1294 = vrot.lane.b32.xlu1 %v1231_v10, %s1767_s6 }
 0x30a   : > { %1292 = vrot.lane.b32.xlu0 %v1230_v48, %s1767_s6 }
 0x357   : > { %v1267_v56 = vpop.permute.xlu1 %1266 }
 0x358   : > { %1314 = vst.msk [vmem:[%s2181_s5 + $0x8] sm:$0xff] %vm1312_vm0, %v1267_v56  ;;  %v1265_v54 = vpop.permute.xlu0 %1264 }
 0x359   : > { %1313 = vst.msk [vmem:[%s2181_s5] sm:$0xff] %vm1312_vm0, %v1265_v54 }
 0x35f   : > { %v1271_v22 = vpop.permute.xlu1 %1270 }
 0x360   : > { %1316 = vst.msk [vmem:[%s2181_s5 + $0x18] sm:$0xff] %vm1312_vm0, %v1271_v22  ;;  %v1269_v15 = vpop.permute.xlu0 %1268 }
 0x361   : > { %1315 = vst.msk [vmem:[%s2181_s5 + $0x10] sm:$0xff] %vm1312_vm0, %v1269_v15 }
 0x363   : > { %v1275_v55 = vpop.permute.xlu1 %1274 }
 0x364   : > { %1318 = vst.msk [vmem:[%s2181_s5 + $0x28] sm:$0xff] %vm1312_vm0, %v1275_v55  ;;  %v1273_v62 = vpop.permute.xlu0 %1272 }
 0x365   : > { %1317 = vst.msk [vmem:[%s2181_s5 + $0x20] sm:$0xff] %vm1312_vm0, %v1273_v62 }
 0x36b   : > { %v1283_v18 = vpop.permute.xlu1 %1282 }
 0x36c   : > { %1322 = vst.msk [vmem:[%s2181_s5 + $0x48] sm:$0xff] %vm1312_vm0, %v1283_v18  ;;  %v1281_v19 = vpop.permute.xlu0 %1280 }
 0x36d   : > { %1321 = vst.msk [vmem:[%s2181_s5 + $0x40] sm:$0xff] %vm1312_vm0, %v1281_v19 }
 0x36f   : > { %v1279_v30 = vpop.permute.xlu1 %1278 }
 0x370   : > { %1320 = vst.msk [vmem:[%s2181_s5 + $0x38] sm:$0xff] %vm1312_vm0, %v1279_v30  ;;  %v1277_v57 = vpop.permute.xlu0 %1276 }
 0x371   : > { %1319 = vst.msk [vmem:[%s2181_s5 + $0x30] sm:$0xff] %vm1312_vm0, %v1277_v57 }
 0x373   : > { %v1287_v4 = vpop.permute.xlu1 %1286 }
 0x374   : > { %1324 = vst.msk [vmem:[%s2181_s5 + $0x58] sm:$0xff] %vm1312_vm0, %v1287_v4  ;;  %v1285_v60 = vpop.permute.xlu0 %1284 }
 0x375   : > { %1323 = vst.msk [vmem:[%s2181_s5 + $0x50] sm:$0xff] %vm1312_vm0, %v1285_v60 }
 0x377   : > { %v1291_v34 = vpop.permute.xlu1 %1290 }
 0x378   : > { %1326 = vst.msk [vmem:[%s2181_s5 + $0x68] sm:$0xff] %vm1312_vm0, %v1291_v34  ;;  %v1289_v26 = vpop.permute.xlu0 %1288 }
 0x379   : > { %1325 = vst.msk [vmem:[%s2181_s5 + $0x60] sm:$0xff] %vm1312_vm0, %v1289_v26 }
 0x37b   : > { %v1295_v33 = vpop.permute.xlu1 %1294 }
 0x37c   : > { %1328 = vst.msk [vmem:[%s2181_s5 + $0x78] sm:$0xff] %vm1312_vm0, %v1295_v33  ;;  %v1293_v61 = vpop.permute.xlu0 %1292 }
 0x37d   : > { %1327 = vst.msk [vmem:[%s2181_s5 + $0x70] sm:$0xff] %vm1312_vm0, %v1293_v61 }
 0x37e   : > { %1715 = shalt.err (!%p1712_p3)
}
 0x37f   : > { %s1716_s25 = scalar_lea.hbm %s2280_s17, 2048  ;;  %s1720_s28 = scalar_lea.hbm %s2333_s2, 10240 }
 0x380   : > { %p1717_p4 = scmp.ne.s32.totalorder %s2280_s17, %s1716_s25  ;;  %p1721_p9 = scmp.lt.u32.totalorder %s2280_s17, %s2333_s2 }
 0x381   : > { %p1722_p10 = scmp.lt.u32.totalorder %s1720_s28, %s1716_s25  ;;  %p1724_p12 = scmp.lt.u32.totalorder %s1716_s25, %s2280_s17 }
 0x382   : > { %p1718_p7 = pnand %p1717_p4, %p1824_p5 }
 0x383   : > { %p1723_p11 = por %p1722_p10, %p1721_p9 }
 0x384   : > { %p1719_p8 = pneg %p1718_p7 }
 0x385   : > { %p1725_p13 = por %p1724_p12, %p1723_p11 }
 0x387   : > { %p1726_p0 = pnand %p1725_p13, %p1719_p8 }
 0x389   : > { %1729 = shalt.err (!%p1726_p0)
}
 0x38a   : > { %s1769_s3 = smov 128   ;;  %s1770_s4 = smov 8  }
 0x38b   : > { %1627 = dma.vmem_to_hbm [thread:$0]  (%p1824_p5), %s2282_s8, 2048, %s2280_s17, %s2290_s13, %s1769_s3, %s1769_s3, %s1770_s4  }
 0x38c PF: > { %p1633_p1 = scmp.ge.s32.totalorder %s1764_s12, 2  ;;  %s1359_s5 = sand.u32 1, %s1752_s9  }
 0x38d   : > { %s1360_s6 = scalar_lea.sflag [#allocation3], %s1359_s5 }
 0x38e   : > { %p1630_p2 = pnand %p1633_p1, %p1828_p6 }
 0x390   : > { %1747 = dma.done.wait (!%p1630_p2), %s1360_s6, 2048  }
 0x391   : > { %1749 = vsyncadd (!%p1630_p2), %s1360_s6, 4294965248  ;;  %p12_p3 = scmp.ge.s32.totalorder %s1811_s15, 7   ;;  %s2336_s9 = smov %s1756_s10 }
 0x392   : > { %s2337_s10 = smov %s1760_s11  ;;  %s2338_s11 = smov %s1822_s18 }
 0x393   : > { %s2339_s12 = smov %s1811_s15  ;;  %14 = sbr.rel (!%p12_p3) target bundleno = 3 (0x3), region = 63 }
 0x39a   :  { %1365 = vsyncpa [#allocation3], 1 }
 0x39b   :  { %1367 = vsyncpa [#allocation3 + $0x1], 1 }

</bundles_post_ra>
